<compile_context>
chip_gen: v6e
topology: v6e:2x2x1
jax: 0.10.0
libtpu: 0.0.40
codegen_flags: <defaults>
</compile_context>

<pallas_src>
import functools

import jax
import jax.numpy as jnp
from jax.experimental import pallas as pl
from jax.experimental.pallas import tpu as pltpu

LANE = 128


def _round_up(n, m):
    return (n + m - 1) // m * m


def _pad_to(a, shape):
    return jnp.pad(a, [(0, s - d) for d, s in zip(a.shape, shape)])


def _encoder_kernel(x_ref, w_ih0_ref, w_ihr_ref, w_hh_ref, b_ref,
                    w_fc_ref, b_fc_ref, out_ref, *, num_layers, seq_len, batch_tile):
    T, Bt = seq_len, batch_tile
    Hp = w_hh_ref.shape[-1]

    # Current layer's input sequence, batch-major flat (row = b*T + t), as a value.
    seq = x_ref[...]                                                     # (Bt*T, in_dim)

    for l in range(num_layers):
        w_ih = w_ih0_ref[...] if l == 0 else w_ihr_ref[l - 1]            # (in, Hp)
        w_hh = w_hh_ref[l]                                               # (Hp, Hp)
        b = b_ref[pl.ds(l, 1), :]                                        # (1, Hp) fused bias

        # Hoisted non-recurrent projection for ALL time steps at once (single MXU matmul).
        proj = jnp.dot(seq, w_ih, preferred_element_type=jnp.float32) + b   # (Bt*T, Hp)
        proj = proj.reshape(Bt, T, Hp)

        # Serial recurrence: only h @ W_hh + add + tanh on the critical path,
        # hidden state and layer outputs carried as values (vregs), no VMEM staging.
        h = jnp.tanh(proj[:, 0, :])                          # t=0: prev h is zero, skip matmul
        hs = [h]
        for t in range(1, T):
            h = jnp.tanh(proj[:, t, :] +
                         jnp.dot(h, w_hh, preferred_element_type=jnp.float32))
            hs.append(h)

        # Layer output sequence for the next layer / final FC, still in vregs.
        seq = jnp.stack(hs, axis=1).reshape(Bt * T, Hp)                  # (Bt*T, Hp)

    # Final Linear: one matmul + one lane-dense bulk store of the whole output block.
    y = jnp.dot(seq, w_fc_ref[...], preferred_element_type=jnp.float32) + b_fc_ref[...]
    out_ref[...] = y.astype(out_ref.dtype)


def encoder_forward(x, params, *, num_layers, batch_shards=1):
    T, B, Z = x.shape
    H = params["w_hh_t"].shape[-1]
    L = num_layers
    Lr = params["w_ihr_t"].shape[0]          # = max(L - 1, 1)
    Hp = _round_up(H, LANE)                  # lane-dense hidden width

    assert B % batch_shards == 0, "batch_shards must divide batch"
    Bt = B // batch_shards

    # Zero-pad all hidden dims to Hp: padded lanes stay exactly 0 through tanh and never
    # contribute to real lanes (padded weight rows/cols and biases are zero).
    w_ih0 = _pad_to(params["w_ih0_t"], (Z, Hp))
    w_ihr = _pad_to(params["w_ihr_t"], (Lr, Hp, Hp))
    w_hh = _pad_to(params["w_hh_t"], (L, Hp, Hp))
    b = _pad_to(params["b_ih"] + params["b_hh"], (L, Hp))     # fused RNN biases
    w_fc = _pad_to(params["w_fc_t"], (Hp, Hp))
    b_fc = _pad_to(params["b_fc"], (1, Hp))

    # Batch-major flatten so each grid step gets an aligned (Bt*T, Z) slab.
    xb = jnp.transpose(x, (1, 0, 2)).reshape(B * T, Z)

    kernel = functools.partial(_encoder_kernel, num_layers=L, seq_len=T, batch_tile=Bt)

    out = pl.pallas_call(
        kernel,
        out_shape=jax.ShapeDtypeStruct((B * T, Hp), jnp.float32),
        grid=(batch_shards,),
        in_specs=[
            pl.BlockSpec((Bt * T, Z), lambda i: (i, 0)),       # x, one batch shard
            pl.BlockSpec((Z, Hp), lambda i: (0, 0)),           # W_ih layer 0 (transposed)
            pl.BlockSpec((Lr, Hp, Hp), lambda i: (0, 0, 0)),   # W_ih layers 1.. (transposed)
            pl.BlockSpec((L, Hp, Hp), lambda i: (0, 0, 0)),    # W_hh (transposed)
            pl.BlockSpec((L, Hp), lambda i: (0, 0)),           # fused bias b_ih + b_hh
            pl.BlockSpec((Hp, Hp), lambda i: (0, 0)),          # W_fc (transposed)
            pl.BlockSpec((1, Hp), lambda i: (0, 0)),           # b_fc
        ],
        out_specs=pl.BlockSpec((Bt * T, Hp), lambda i: (i, 0)),
        compiler_params=pltpu.CompilerParams(
            # Batch shards are independent -> lets v7x run them on both TensorCores.
            dimension_semantics=("parallel",)),
    )(xb, w_ih0, w_ihr, w_hh, b, w_fc, b_fc)

    # Un-pad and return time-major (T, B, H).
    return out.reshape(B, T, Hp)[:, :, :H].transpose(1, 0, 2)


def encoder_reference(x, params, *, num_layers):
    """Pure-JAX reference (mirrors PyTorch nn.RNN + nn.Linear semantics), f32 matmuls."""
    T, B, _ = x.shape
    H = params["w_hh_t"].shape[-1]
    hp = jax.lax.Precision.HIGHEST
    seq = x
    for l in range(num_layers):
        w_ih_t = params["w_ih0_t"] if l == 0 else params["w_ihr_t"][l - 1]
        w_hh_t = params["w_hh_t"][l]
        bias = params["b_ih"][l] + params["b_hh"][l]
        h = jnp.zeros((B, H), jnp.float32)
        outs = []
        for t in range(T):
            h = jnp.tanh(jnp.dot(seq[t], w_ih_t, precision=hp) + bias
                         + jnp.dot(h, w_hh_t, precision=hp))
            outs.append(h)
        seq = jnp.stack(outs)
    return jnp.dot(seq, params["w_fc_t"], precision=hp) + params["b_fc"]


def init_params(key, z_dim, hidden_dim, num_layers):
    ks = jax.random.split(key, 7)
    scale = 0.1
    n_rec = max(num_layers - 1, 1)
    # Weights stored pre-transposed (input_dim, hidden_dim) so the kernel does x @ W.
    w_ih0_t = scale * jax.random.normal(ks[0], (z_dim, hidden_dim), jnp.float32)
    w_ihr_t = scale * jax.random.normal(ks[1], (n_rec, hidden_dim, hidden_dim), jnp.float32)
    w_hh_t = scale * jax.random.normal(ks[2], (num_layers, hidden_dim, hidden_dim), jnp.float32)
    b_ih = scale * jax.random.normal(ks[3], (num_layers, hidden_dim), jnp.float32)
    b_hh = scale * jax.random.normal(ks[4], (num_layers, hidden_dim), jnp.float32)
    w_fc_t = scale * jax.random.normal(ks[5], (hidden_dim, hidden_dim), jnp.float32)
    b_fc = scale * jax.random.normal(ks[6], (1, hidden_dim), jnp.float32)
    return dict(w_ih0_t=w_ih0_t, w_ihr_t=w_ihr_t, w_hh_t=w_hh_t,
                b_ih=b_ih, b_hh=b_hh, w_fc_t=w_fc_t, b_fc=b_fc)


if __name__ == "__main__":
    cfg = {"z_dim": 6, "hidden_dim": 12, "num_layers": 3}
    seq_len, batch = 8, 2

    key = jax.random.PRNGKey(0)
    k_x, k_p = jax.random.split(key)
    x = jax.random.normal(k_x, (seq_len, batch, cfg["z_dim"]), jnp.float32)
    params = init_params(k_p, cfg["z_dim"], cfg["hidden_dim"], cfg["num_layers"])

    ref = encoder_reference(x, params, num_layers=cfg["num_layers"])

    # Single grid step: whole batch on one TensorCore (best for v5e/v6e).
    out1 = jax.block_until_ready(
        encoder_forward(x, params, num_layers=cfg["num_layers"], batch_shards=1))
    # Batch-sharded 'parallel' grid: lets v7x split independent sequences across its 2 TCs.
    out2 = jax.block_until_ready(
        encoder_forward(x, params, num_layers=cfg["num_layers"], batch_shards=batch))

    assert out1.shape == (seq_len, batch, cfg["hidden_dim"])
    assert jnp.allclose(out1, ref, atol=1e-4, rtol=1e-4), "mismatch (batch_shards=1)"
    assert jnp.allclose(out2, ref, atol=1e-4, rtol=1e-4), "mismatch (batch_shards=2)"

    print("KERNEL_OK")
</pallas_src>

<mosaic_0001>
module attributes {stable_mosaic.version = 11 : i64} {
  func.func @_encoder_kernel(%arg0: i32, %arg1: memref<16x6xf32, #tpu.memory_space<vmem>>, %arg2: memref<6x128xf32, #tpu.memory_space<vmem>>, %arg3: memref<2x128x128xf32, #tpu.memory_space<vmem>>, %arg4: memref<3x128x128xf32, #tpu.memory_space<vmem>>, %arg5: memref<3x128xf32, #tpu.memory_space<vmem>>, %arg6: memref<128x128xf32, #tpu.memory_space<vmem>>, %arg7: memref<1x128xf32, #tpu.memory_space<vmem>>, %arg8: memref<16x128xf32, #tpu.memory_space<vmem>>) attributes {dimension_semantics = [#tpu.dimension_semantics<parallel>], iteration_bounds = array<i64: 1>, scalar_prefetch = 0 : i64, scratch_operands = 0 : i64, tpu.core_type = #tpu.core_type<tc>, window_params = [{transform_indices = @transform_0, window_bounds = array<i64: 16, 6>}, {pipeline_mode = #tpu.pipeline_mode<synchronous>, transform_indices = @transform_1, window_bounds = array<i64: 6, 128>}, {pipeline_mode = #tpu.pipeline_mode<synchronous>, transform_indices = @transform_2, window_bounds = array<i64: 2, 128, 128>}, {pipeline_mode = #tpu.pipeline_mode<synchronous>, transform_indices = @transform_3, window_bounds = array<i64: 3, 128, 128>}, {pipeline_mode = #tpu.pipeline_mode<synchronous>, transform_indices = @transform_4, window_bounds = array<i64: 3, 128>}, {pipeline_mode = #tpu.pipeline_mode<synchronous>, transform_indices = @transform_5, window_bounds = array<i64: 128, 128>}, {pipeline_mode = #tpu.pipeline_mode<synchronous>, transform_indices = @transform_6, window_bounds = array<i64: 1, 128>}, {transform_indices = @transform_7, window_bounds = array<i64: 16, 128>}]} {
    %c0 = arith.constant 0 : index
    %c0_0 = arith.constant 0 : index
    %0 = vector.load %arg1[%c0, %c0_0] : memref<16x6xf32, #tpu.memory_space<vmem>>, vector<16x6xf32>
    %c0_1 = arith.constant 0 : index
    %c0_2 = arith.constant 0 : index
    %1 = vector.load %arg2[%c0_1, %c0_2] : memref<6x128xf32, #tpu.memory_space<vmem>>, vector<6x128xf32>
    %c0_3 = arith.constant 0 : index
    %c0_4 = arith.constant 0 : index
    %c0_5 = arith.constant 0 : index
    %2 = vector.load %arg4[%c0_3, %c0_4, %c0_5] : memref<3x128x128xf32, #tpu.memory_space<vmem>>, vector<1x128x128xf32>
    %3 = vector.shape_cast %2 : vector<1x128x128xf32> to vector<128x128xf32>
    %c0_6 = arith.constant 0 : index
    %c0_7 = arith.constant 0 : index
    %4 = vector.load %arg5[%c0_6, %c0_7] : memref<3x128xf32, #tpu.memory_space<vmem>>, vector<1x128xf32>
    %cst = arith.constant dense<0.000000e+00> : vector<16x128xf32>
    %5 = tpu.matmul %0, %1, %cst {dimension_numbers = #tpu.dot_dimension_numbers<[1], [0], [0], [1], [0, 0, 1, 1], [], []>} : vector<16x6xf32>, vector<6x128xf32>, vector<16x128xf32> -> vector<16x128xf32>
    %6 = vector.broadcast %4 : vector<1x128xf32> to vector<16x128xf32>
    %7 = arith.addf %5, %6 : vector<16x128xf32>
    %8 = vector.shape_cast %7 : vector<16x128xf32> to vector<2x8x128xf32>
    %9 = vector.extract_strided_slice %8 {offsets = [0, 0, 0], sizes = [2, 1, 128], strides = [1, 1, 1]} : vector<2x8x128xf32> to vector<2x1x128xf32>
    %10 = vector.shape_cast %9 : vector<2x1x128xf32> to vector<2x128xf32>
    %11 = math.tanh %10 : vector<2x128xf32>
    %12 = vector.extract_strided_slice %8 {offsets = [0, 1, 0], sizes = [2, 1, 128], strides = [1, 1, 1]} : vector<2x8x128xf32> to vector<2x1x128xf32>
    %13 = vector.shape_cast %12 : vector<2x1x128xf32> to vector<2x128xf32>
    %cst_8 = arith.constant dense<0.000000e+00> : vector<2x128xf32>
    %14 = tpu.matmul %11, %3, %cst_8 {dimension_numbers = #tpu.dot_dimension_numbers<[1], [0], [0], [1], [0, 0, 1, 1], [], []>} : vector<2x128xf32>, vector<128x128xf32>, vector<2x128xf32> -> vector<2x128xf32>
    %15 = arith.addf %13, %14 : vector<2x128xf32>
    %16 = math.tanh %15 : vector<2x128xf32>
    %17 = vector.extract_strided_slice %8 {offsets = [0, 2, 0], sizes = [2, 1, 128], strides = [1, 1, 1]} : vector<2x8x128xf32> to vector<2x1x128xf32>
    %18 = vector.shape_cast %17 : vector<2x1x128xf32> to vector<2x128xf32>
    %cst_9 = arith.constant dense<0.000000e+00> : vector<2x128xf32>
    %19 = tpu.matmul %16, %3, %cst_9 {dimension_numbers = #tpu.dot_dimension_numbers<[1], [0], [0], [1], [0, 0, 1, 1], [], []>} : vector<2x128xf32>, vector<128x128xf32>, vector<2x128xf32> -> vector<2x128xf32>
    %20 = arith.addf %18, %19 : vector<2x128xf32>
    %21 = math.tanh %20 : vector<2x128xf32>
    %22 = vector.extract_strided_slice %8 {offsets = [0, 3, 0], sizes = [2, 1, 128], strides = [1, 1, 1]} : vector<2x8x128xf32> to vector<2x1x128xf32>
    %23 = vector.shape_cast %22 : vector<2x1x128xf32> to vector<2x128xf32>
    %cst_10 = arith.constant dense<0.000000e+00> : vector<2x128xf32>
    %24 = tpu.matmul %21, %3, %cst_10 {dimension_numbers = #tpu.dot_dimension_numbers<[1], [0], [0], [1], [0, 0, 1, 1], [], []>} : vector<2x128xf32>, vector<128x128xf32>, vector<2x128xf32> -> vector<2x128xf32>
    %25 = arith.addf %23, %24 : vector<2x128xf32>
    %26 = math.tanh %25 : vector<2x128xf32>
    %27 = vector.extract_strided_slice %8 {offsets = [0, 4, 0], sizes = [2, 1, 128], strides = [1, 1, 1]} : vector<2x8x128xf32> to vector<2x1x128xf32>
    %28 = vector.shape_cast %27 : vector<2x1x128xf32> to vector<2x128xf32>
    %cst_11 = arith.constant dense<0.000000e+00> : vector<2x128xf32>
    %29 = tpu.matmul %26, %3, %cst_11 {dimension_numbers = #tpu.dot_dimension_numbers<[1], [0], [0], [1], [0, 0, 1, 1], [], []>} : vector<2x128xf32>, vector<128x128xf32>, vector<2x128xf32> -> vector<2x128xf32>
    %30 = arith.addf %28, %29 : vector<2x128xf32>
    %31 = math.tanh %30 : vector<2x128xf32>
    %32 = vector.extract_strided_slice %8 {offsets = [0, 5, 0], sizes = [2, 1, 128], strides = [1, 1, 1]} : vector<2x8x128xf32> to vector<2x1x128xf32>
    %33 = vector.shape_cast %32 : vector<2x1x128xf32> to vector<2x128xf32>
    %cst_12 = arith.constant dense<0.000000e+00> : vector<2x128xf32>
    %34 = tpu.matmul %31, %3, %cst_12 {dimension_numbers = #tpu.dot_dimension_numbers<[1], [0], [0], [1], [0, 0, 1, 1], [], []>} : vector<2x128xf32>, vector<128x128xf32>, vector<2x128xf32> -> vector<2x128xf32>
    %35 = arith.addf %33, %34 : vector<2x128xf32>
    %36 = math.tanh %35 : vector<2x128xf32>
    %37 = vector.extract_strided_slice %8 {offsets = [0, 6, 0], sizes = [2, 1, 128], strides = [1, 1, 1]} : vector<2x8x128xf32> to vector<2x1x128xf32>
    %38 = vector.shape_cast %37 : vector<2x1x128xf32> to vector<2x128xf32>
    %cst_13 = arith.constant dense<0.000000e+00> : vector<2x128xf32>
    %39 = tpu.matmul %36, %3, %cst_13 {dimension_numbers = #tpu.dot_dimension_numbers<[1], [0], [0], [1], [0, 0, 1, 1], [], []>} : vector<2x128xf32>, vector<128x128xf32>, vector<2x128xf32> -> vector<2x128xf32>
    %40 = arith.addf %38, %39 : vector<2x128xf32>
    %41 = math.tanh %40 : vector<2x128xf32>
    %42 = vector.extract_strided_slice %8 {offsets = [0, 7, 0], sizes = [2, 1, 128], strides = [1, 1, 1]} : vector<2x8x128xf32> to vector<2x1x128xf32>
    %43 = vector.shape_cast %42 : vector<2x1x128xf32> to vector<2x128xf32>
    %cst_14 = arith.constant dense<0.000000e+00> : vector<2x128xf32>
    %44 = tpu.matmul %41, %3, %cst_14 {dimension_numbers = #tpu.dot_dimension_numbers<[1], [0], [0], [1], [0, 0, 1, 1], [], []>} : vector<2x128xf32>, vector<128x128xf32>, vector<2x128xf32> -> vector<2x128xf32>
    %45 = arith.addf %43, %44 : vector<2x128xf32>
    %46 = math.tanh %45 : vector<2x128xf32>
    %47 = vector.shape_cast %11 : vector<2x128xf32> to vector<2x1x128xf32>
    %48 = vector.shape_cast %16 : vector<2x128xf32> to vector<2x1x128xf32>
    %49 = vector.shape_cast %21 : vector<2x128xf32> to vector<2x1x128xf32>
    %50 = vector.shape_cast %26 : vector<2x128xf32> to vector<2x1x128xf32>
    %51 = vector.shape_cast %31 : vector<2x128xf32> to vector<2x1x128xf32>
    %52 = vector.shape_cast %36 : vector<2x128xf32> to vector<2x1x128xf32>
    %53 = vector.shape_cast %41 : vector<2x128xf32> to vector<2x1x128xf32>
    %54 = vector.shape_cast %46 : vector<2x128xf32> to vector<2x1x128xf32>
    %55 = tpu.concatenate %47, %48, %49, %50, %51, %52, %53, %54 in 1 : vector<2x1x128xf32>, vector<2x1x128xf32>, vector<2x1x128xf32>, vector<2x1x128xf32>, vector<2x1x128xf32>, vector<2x1x128xf32>, vector<2x1x128xf32>, vector<2x1x128xf32> -> vector<2x8x128xf32>
    %56 = vector.shape_cast %55 : vector<2x8x128xf32> to vector<16x128xf32>
    %c0_15 = arith.constant 0 : index
    %c0_16 = arith.constant 0 : index
    %c0_17 = arith.constant 0 : index
    %57 = vector.load %arg3[%c0_15, %c0_16, %c0_17] : memref<2x128x128xf32, #tpu.memory_space<vmem>>, vector<1x128x128xf32>
    %58 = vector.shape_cast %57 : vector<1x128x128xf32> to vector<128x128xf32>
    %c1 = arith.constant 1 : index
    %c0_18 = arith.constant 0 : index
    %c0_19 = arith.constant 0 : index
    %59 = vector.load %arg4[%c1, %c0_18, %c0_19] : memref<3x128x128xf32, #tpu.memory_space<vmem>>, vector<1x128x128xf32>
    %60 = vector.shape_cast %59 : vector<1x128x128xf32> to vector<128x128xf32>
    %c1_20 = arith.constant 1 : index
    %c0_21 = arith.constant 0 : index
    %61 = vector.load %arg5[%c1_20, %c0_21] : memref<3x128xf32, #tpu.memory_space<vmem>>, vector<1x128xf32>
    %cst_22 = arith.constant dense<0.000000e+00> : vector<16x128xf32>
    %62 = tpu.matmul %56, %58, %cst_22 {dimension_numbers = #tpu.dot_dimension_numbers<[1], [0], [0], [1], [0, 0, 1, 1], [], []>} : vector<16x128xf32>, vector<128x128xf32>, vector<16x128xf32> -> vector<16x128xf32>
    %63 = vector.broadcast %61 : vector<1x128xf32> to vector<16x128xf32>
    %64 = arith.addf %62, %63 : vector<16x128xf32>
    %65 = vector.shape_cast %64 : vector<16x128xf32> to vector<2x8x128xf32>
    %66 = vector.extract_strided_slice %65 {offsets = [0, 0, 0], sizes = [2, 1, 128], strides = [1, 1, 1]} : vector<2x8x128xf32> to vector<2x1x128xf32>
    %67 = vector.shape_cast %66 : vector<2x1x128xf32> to vector<2x128xf32>
    %68 = math.tanh %67 : vector<2x128xf32>
    %69 = vector.extract_strided_slice %65 {offsets = [0, 1, 0], sizes = [2, 1, 128], strides = [1, 1, 1]} : vector<2x8x128xf32> to vector<2x1x128xf32>
    %70 = vector.shape_cast %69 : vector<2x1x128xf32> to vector<2x128xf32>
    %cst_23 = arith.constant dense<0.000000e+00> : vector<2x128xf32>
    %71 = tpu.matmul %68, %60, %cst_23 {dimension_numbers = #tpu.dot_dimension_numbers<[1], [0], [0], [1], [0, 0, 1, 1], [], []>} : vector<2x128xf32>, vector<128x128xf32>, vector<2x128xf32> -> vector<2x128xf32>
    %72 = arith.addf %70, %71 : vector<2x128xf32>
    %73 = math.tanh %72 : vector<2x128xf32>
    %74 = vector.extract_strided_slice %65 {offsets = [0, 2, 0], sizes = [2, 1, 128], strides = [1, 1, 1]} : vector<2x8x128xf32> to vector<2x1x128xf32>
    %75 = vector.shape_cast %74 : vector<2x1x128xf32> to vector<2x128xf32>
    %cst_24 = arith.constant dense<0.000000e+00> : vector<2x128xf32>
    %76 = tpu.matmul %73, %60, %cst_24 {dimension_numbers = #tpu.dot_dimension_numbers<[1], [0], [0], [1], [0, 0, 1, 1], [], []>} : vector<2x128xf32>, vector<128x128xf32>, vector<2x128xf32> -> vector<2x128xf32>
    %77 = arith.addf %75, %76 : vector<2x128xf32>
    %78 = math.tanh %77 : vector<2x128xf32>
    %79 = vector.extract_strided_slice %65 {offsets = [0, 3, 0], sizes = [2, 1, 128], strides = [1, 1, 1]} : vector<2x8x128xf32> to vector<2x1x128xf32>
    %80 = vector.shape_cast %79 : vector<2x1x128xf32> to vector<2x128xf32>
    %cst_25 = arith.constant dense<0.000000e+00> : vector<2x128xf32>
    %81 = tpu.matmul %78, %60, %cst_25 {dimension_numbers = #tpu.dot_dimension_numbers<[1], [0], [0], [1], [0, 0, 1, 1], [], []>} : vector<2x128xf32>, vector<128x128xf32>, vector<2x128xf32> -> vector<2x128xf32>
    %82 = arith.addf %80, %81 : vector<2x128xf32>
    %83 = math.tanh %82 : vector<2x128xf32>
    %84 = vector.extract_strided_slice %65 {offsets = [0, 4, 0], sizes = [2, 1, 128], strides = [1, 1, 1]} : vector<2x8x128xf32> to vector<2x1x128xf32>
    %85 = vector.shape_cast %84 : vector<2x1x128xf32> to vector<2x128xf32>
    %cst_26 = arith.constant dense<0.000000e+00> : vector<2x128xf32>
    %86 = tpu.matmul %83, %60, %cst_26 {dimension_numbers = #tpu.dot_dimension_numbers<[1], [0], [0], [1], [0, 0, 1, 1], [], []>} : vector<2x128xf32>, vector<128x128xf32>, vector<2x128xf32> -> vector<2x128xf32>
    %87 = arith.addf %85, %86 : vector<2x128xf32>
    %88 = math.tanh %87 : vector<2x128xf32>
    %89 = vector.extract_strided_slice %65 {offsets = [0, 5, 0], sizes = [2, 1, 128], strides = [1, 1, 1]} : vector<2x8x128xf32> to vector<2x1x128xf32>
    %90 = vector.shape_cast %89 : vector<2x1x128xf32> to vector<2x128xf32>
    %cst_27 = arith.constant dense<0.000000e+00> : vector<2x128xf32>
    %91 = tpu.matmul %88, %60, %cst_27 {dimension_numbers = #tpu.dot_dimension_numbers<[1], [0], [0], [1], [0, 0, 1, 1], [], []>} : vector<2x128xf32>, vector<128x128xf32>, vector<2x128xf32> -> vector<2x128xf32>
    %92 = arith.addf %90, %91 : vector<2x128xf32>
    %93 = math.tanh %92 : vector<2x128xf32>
    %94 = vector.extract_strided_slice %65 {offsets = [0, 6, 0], sizes = [2, 1, 128], strides = [1, 1, 1]} : vector<2x8x128xf32> to vector<2x1x128xf32>
    %95 = vector.shape_cast %94 : vector<2x1x128xf32> to vector<2x128xf32>
    %cst_28 = arith.constant dense<0.000000e+00> : vector<2x128xf32>
    %96 = tpu.matmul %93, %60, %cst_28 {dimension_numbers = #tpu.dot_dimension_numbers<[1], [0], [0], [1], [0, 0, 1, 1], [], []>} : vector<2x128xf32>, vector<128x128xf32>, vector<2x128xf32> -> vector<2x128xf32>
    %97 = arith.addf %95, %96 : vector<2x128xf32>
    %98 = math.tanh %97 : vector<2x128xf32>
    %99 = vector.extract_strided_slice %65 {offsets = [0, 7, 0], sizes = [2, 1, 128], strides = [1, 1, 1]} : vector<2x8x128xf32> to vector<2x1x128xf32>
    %100 = vector.shape_cast %99 : vector<2x1x128xf32> to vector<2x128xf32>
    %cst_29 = arith.constant dense<0.000000e+00> : vector<2x128xf32>
    %101 = tpu.matmul %98, %60, %cst_29 {dimension_numbers = #tpu.dot_dimension_numbers<[1], [0], [0], [1], [0, 0, 1, 1], [], []>} : vector<2x128xf32>, vector<128x128xf32>, vector<2x128xf32> -> vector<2x128xf32>
    %102 = arith.addf %100, %101 : vector<2x128xf32>
    %103 = math.tanh %102 : vector<2x128xf32>
    %104 = vector.shape_cast %68 : vector<2x128xf32> to vector<2x1x128xf32>
    %105 = vector.shape_cast %73 : vector<2x128xf32> to vector<2x1x128xf32>
    %106 = vector.shape_cast %78 : vector<2x128xf32> to vector<2x1x128xf32>
    %107 = vector.shape_cast %83 : vector<2x128xf32> to vector<2x1x128xf32>
    %108 = vector.shape_cast %88 : vector<2x128xf32> to vector<2x1x128xf32>
    %109 = vector.shape_cast %93 : vector<2x128xf32> to vector<2x1x128xf32>
    %110 = vector.shape_cast %98 : vector<2x128xf32> to vector<2x1x128xf32>
    %111 = vector.shape_cast %103 : vector<2x128xf32> to vector<2x1x128xf32>
    %112 = tpu.concatenate %104, %105, %106, %107, %108, %109, %110, %111 in 1 : vector<2x1x128xf32>, vector<2x1x128xf32>, vector<2x1x128xf32>, vector<2x1x128xf32>, vector<2x1x128xf32>, vector<2x1x128xf32>, vector<2x1x128xf32>, vector<2x1x128xf32> -> vector<2x8x128xf32>
    %113 = vector.shape_cast %112 : vector<2x8x128xf32> to vector<16x128xf32>
    %c1_30 = arith.constant 1 : index
    %c0_31 = arith.constant 0 : index
    %c0_32 = arith.constant 0 : index
    %114 = vector.load %arg3[%c1_30, %c0_31, %c0_32] : memref<2x128x128xf32, #tpu.memory_space<vmem>>, vector<1x128x128xf32>
    %115 = vector.shape_cast %114 : vector<1x128x128xf32> to vector<128x128xf32>
    %c2 = arith.constant 2 : index
    %c0_33 = arith.constant 0 : index
    %c0_34 = arith.constant 0 : index
    %116 = vector.load %arg4[%c2, %c0_33, %c0_34] : memref<3x128x128xf32, #tpu.memory_space<vmem>>, vector<1x128x128xf32>
    %117 = vector.shape_cast %116 : vector<1x128x128xf32> to vector<128x128xf32>
    %c2_35 = arith.constant 2 : index
    %c0_36 = arith.constant 0 : index
    %118 = vector.load %arg5[%c2_35, %c0_36] : memref<3x128xf32, #tpu.memory_space<vmem>>, vector<1x128xf32>
    %cst_37 = arith.constant dense<0.000000e+00> : vector<16x128xf32>
    %119 = tpu.matmul %113, %115, %cst_37 {dimension_numbers = #tpu.dot_dimension_numbers<[1], [0], [0], [1], [0, 0, 1, 1], [], []>} : vector<16x128xf32>, vector<128x128xf32>, vector<16x128xf32> -> vector<16x128xf32>
    %120 = vector.broadcast %118 : vector<1x128xf32> to vector<16x128xf32>
    %121 = arith.addf %119, %120 : vector<16x128xf32>
    %122 = vector.shape_cast %121 : vector<16x128xf32> to vector<2x8x128xf32>
    %123 = vector.extract_strided_slice %122 {offsets = [0, 0, 0], sizes = [2, 1, 128], strides = [1, 1, 1]} : vector<2x8x128xf32> to vector<2x1x128xf32>
    %124 = vector.shape_cast %123 : vector<2x1x128xf32> to vector<2x128xf32>
    %125 = math.tanh %124 : vector<2x128xf32>
    %126 = vector.extract_strided_slice %122 {offsets = [0, 1, 0], sizes = [2, 1, 128], strides = [1, 1, 1]} : vector<2x8x128xf32> to vector<2x1x128xf32>
    %127 = vector.shape_cast %126 : vector<2x1x128xf32> to vector<2x128xf32>
    %cst_38 = arith.constant dense<0.000000e+00> : vector<2x128xf32>
    %128 = tpu.matmul %125, %117, %cst_38 {dimension_numbers = #tpu.dot_dimension_numbers<[1], [0], [0], [1], [0, 0, 1, 1], [], []>} : vector<2x128xf32>, vector<128x128xf32>, vector<2x128xf32> -> vector<2x128xf32>
    %129 = arith.addf %127, %128 : vector<2x128xf32>
    %130 = math.tanh %129 : vector<2x128xf32>
    %131 = vector.extract_strided_slice %122 {offsets = [0, 2, 0], sizes = [2, 1, 128], strides = [1, 1, 1]} : vector<2x8x128xf32> to vector<2x1x128xf32>
    %132 = vector.shape_cast %131 : vector<2x1x128xf32> to vector<2x128xf32>
    %cst_39 = arith.constant dense<0.000000e+00> : vector<2x128xf32>
    %133 = tpu.matmul %130, %117, %cst_39 {dimension_numbers = #tpu.dot_dimension_numbers<[1], [0], [0], [1], [0, 0, 1, 1], [], []>} : vector<2x128xf32>, vector<128x128xf32>, vector<2x128xf32> -> vector<2x128xf32>
    %134 = arith.addf %132, %133 : vector<2x128xf32>
    %135 = math.tanh %134 : vector<2x128xf32>
    %136 = vector.extract_strided_slice %122 {offsets = [0, 3, 0], sizes = [2, 1, 128], strides = [1, 1, 1]} : vector<2x8x128xf32> to vector<2x1x128xf32>
    %137 = vector.shape_cast %136 : vector<2x1x128xf32> to vector<2x128xf32>
    %cst_40 = arith.constant dense<0.000000e+00> : vector<2x128xf32>
    %138 = tpu.matmul %135, %117, %cst_40 {dimension_numbers = #tpu.dot_dimension_numbers<[1], [0], [0], [1], [0, 0, 1, 1], [], []>} : vector<2x128xf32>, vector<128x128xf32>, vector<2x128xf32> -> vector<2x128xf32>
    %139 = arith.addf %137, %138 : vector<2x128xf32>
    %140 = math.tanh %139 : vector<2x128xf32>
    %141 = vector.extract_strided_slice %122 {offsets = [0, 4, 0], sizes = [2, 1, 128], strides = [1, 1, 1]} : vector<2x8x128xf32> to vector<2x1x128xf32>
    %142 = vector.shape_cast %141 : vector<2x1x128xf32> to vector<2x128xf32>
    %cst_41 = arith.constant dense<0.000000e+00> : vector<2x128xf32>
    %143 = tpu.matmul %140, %117, %cst_41 {dimension_numbers = #tpu.dot_dimension_numbers<[1], [0], [0], [1], [0, 0, 1, 1], [], []>} : vector<2x128xf32>, vector<128x128xf32>, vector<2x128xf32> -> vector<2x128xf32>
    %144 = arith.addf %142, %143 : vector<2x128xf32>
    %145 = math.tanh %144 : vector<2x128xf32>
    %146 = vector.extract_strided_slice %122 {offsets = [0, 5, 0], sizes = [2, 1, 128], strides = [1, 1, 1]} : vector<2x8x128xf32> to vector<2x1x128xf32>
    %147 = vector.shape_cast %146 : vector<2x1x128xf32> to vector<2x128xf32>
    %cst_42 = arith.constant dense<0.000000e+00> : vector<2x128xf32>
    %148 = tpu.matmul %145, %117, %cst_42 {dimension_numbers = #tpu.dot_dimension_numbers<[1], [0], [0], [1], [0, 0, 1, 1], [], []>} : vector<2x128xf32>, vector<128x128xf32>, vector<2x128xf32> -> vector<2x128xf32>
    %149 = arith.addf %147, %148 : vector<2x128xf32>
    %150 = math.tanh %149 : vector<2x128xf32>
    %151 = vector.extract_strided_slice %122 {offsets = [0, 6, 0], sizes = [2, 1, 128], strides = [1, 1, 1]} : vector<2x8x128xf32> to vector<2x1x128xf32>
    %152 = vector.shape_cast %151 : vector<2x1x128xf32> to vector<2x128xf32>
    %cst_43 = arith.constant dense<0.000000e+00> : vector<2x128xf32>
    %153 = tpu.matmul %150, %117, %cst_43 {dimension_numbers = #tpu.dot_dimension_numbers<[1], [0], [0], [1], [0, 0, 1, 1], [], []>} : vector<2x128xf32>, vector<128x128xf32>, vector<2x128xf32> -> vector<2x128xf32>
    %154 = arith.addf %152, %153 : vector<2x128xf32>
    %155 = math.tanh %154 : vector<2x128xf32>
    %156 = vector.extract_strided_slice %122 {offsets = [0, 7, 0], sizes = [2, 1, 128], strides = [1, 1, 1]} : vector<2x8x128xf32> to vector<2x1x128xf32>
    %157 = vector.shape_cast %156 : vector<2x1x128xf32> to vector<2x128xf32>
    %cst_44 = arith.constant dense<0.000000e+00> : vector<2x128xf32>
    %158 = tpu.matmul %155, %117, %cst_44 {dimension_numbers = #tpu.dot_dimension_numbers<[1], [0], [0], [1], [0, 0, 1, 1], [], []>} : vector<2x128xf32>, vector<128x128xf32>, vector<2x128xf32> -> vector<2x128xf32>
    %159 = arith.addf %157, %158 : vector<2x128xf32>
    %160 = math.tanh %159 : vector<2x128xf32>
    %161 = vector.shape_cast %125 : vector<2x128xf32> to vector<2x1x128xf32>
    %162 = vector.shape_cast %130 : vector<2x128xf32> to vector<2x1x128xf32>
    %163 = vector.shape_cast %135 : vector<2x128xf32> to vector<2x1x128xf32>
    %164 = vector.shape_cast %140 : vector<2x128xf32> to vector<2x1x128xf32>
    %165 = vector.shape_cast %145 : vector<2x128xf32> to vector<2x1x128xf32>
    %166 = vector.shape_cast %150 : vector<2x128xf32> to vector<2x1x128xf32>
    %167 = vector.shape_cast %155 : vector<2x128xf32> to vector<2x1x128xf32>
    %168 = vector.shape_cast %160 : vector<2x128xf32> to vector<2x1x128xf32>
    %169 = tpu.concatenate %161, %162, %163, %164, %165, %166, %167, %168 in 1 : vector<2x1x128xf32>, vector<2x1x128xf32>, vector<2x1x128xf32>, vector<2x1x128xf32>, vector<2x1x128xf32>, vector<2x1x128xf32>, vector<2x1x128xf32>, vector<2x1x128xf32> -> vector<2x8x128xf32>
    %170 = vector.shape_cast %169 : vector<2x8x128xf32> to vector<16x128xf32>
    %c0_45 = arith.constant 0 : index
    %c0_46 = arith.constant 0 : index
    %171 = vector.load %arg6[%c0_45, %c0_46] : memref<128x128xf32, #tpu.memory_space<vmem>>, vector<128x128xf32>
    %cst_47 = arith.constant dense<0.000000e+00> : vector<16x128xf32>
    %172 = tpu.matmul %170, %171, %cst_47 {dimension_numbers = #tpu.dot_dimension_numbers<[1], [0], [0], [1], [0, 0, 1, 1], [], []>} : vector<16x128xf32>, vector<128x128xf32>, vector<16x128xf32> -> vector<16x128xf32>
    %c0_48 = arith.constant 0 : index
    %c0_49 = arith.constant 0 : index
    %173 = vector.load %arg7[%c0_48, %c0_49] : memref<1x128xf32, #tpu.memory_space<vmem>>, vector<1x128xf32>
    %174 = vector.broadcast %173 : vector<1x128xf32> to vector<16x128xf32>
    %175 = arith.addf %172, %174 : vector<16x128xf32>
    %c0_50 = arith.constant 0 : index
    %c0_51 = arith.constant 0 : index
    %176 = vector.load %arg8[%c0_50, %c0_51] : memref<16x128xf32, #tpu.memory_space<vmem>>, vector<16x128xf32>
    tpu.vector_store %arg8[%c0_50, %c0_51], %175 {strides = array<i32>} : memref<16x128xf32, #tpu.memory_space<vmem>>, vector<16x128xf32>,
    return
  }
  func.func @transform_0(%arg0: i32) -> (i32, i32) {
    %c0_i32 = arith.constant 0 : i32
    %c0_i32_0 = arith.constant 0 : i32
    return %arg0, %c0_i32 : i32, i32
  }
  func.func @transform_1(%arg0: i32) -> (i32, i32) {
    %c0_i32 = arith.constant 0 : i32
    %c0_i32_0 = arith.constant 0 : i32
    %c0_i32_1 = arith.constant 0 : i32
    return %c0_i32, %c0_i32_0 : i32, i32
  }
  func.func @transform_2(%arg0: i32) -> (i32, i32, i32) {
    %c0_i32 = arith.constant 0 : i32
    %c0_i32_0 = arith.constant 0 : i32
    %c0_i32_1 = arith.constant 0 : i32
    %c0_i32_2 = arith.constant 0 : i32
    return %c0_i32, %c0_i32_0, %c0_i32_1 : i32, i32, i32
  }
  func.func @transform_3(%arg0: i32) -> (i32, i32, i32) {
    %c0_i32 = arith.constant 0 : i32
    %c0_i32_0 = arith.constant 0 : i32
    %c0_i32_1 = arith.constant 0 : i32
    %c0_i32_2 = arith.constant 0 : i32
    return %c0_i32, %c0_i32_0, %c0_i32_1 : i32, i32, i32
  }
  func.func @transform_4(%arg0: i32) -> (i32, i32) {
    %c0_i32 = arith.constant 0 : i32
    %c0_i32_0 = arith.constant 0 : i32
    %c0_i32_1 = arith.constant 0 : i32
    return %c0_i32, %c0_i32_0 : i32, i32
  }
  func.func @transform_5(%arg0: i32) -> (i32, i32) {
    %c0_i32 = arith.constant 0 : i32
    %c0_i32_0 = arith.constant 0 : i32
    %c0_i32_1 = arith.constant 0 : i32
    return %c0_i32, %c0_i32_0 : i32, i32
  }
  func.func @transform_6(%arg0: i32) -> (i32, i32) {
    %c0_i32 = arith.constant 0 : i32
    %c0_i32_0 = arith.constant 0 : i32
    %c0_i32_1 = arith.constant 0 : i32
    return %c0_i32, %c0_i32_0 : i32, i32
  }
  func.func @transform_7(%arg0: i32) -> (i32, i32) {
    %c0_i32 = arith.constant 0 : i32
    %c0_i32_0 = arith.constant 0 : i32
    return %arg0, %c0_i32 : i32, i32
  }
}

</mosaic_0001>

<bundles_post_ra>
// kernel: tpu_custom_call.1
= control target key start
LH: loop header
LB: loop body
LE: loop exit
PB: predicated region body
PF: predicated region fallthrough
CT: control target
= control target key end

     0   :  { %12 = vsyncpa [#allocation3], 0  ;;  %s4874_s0 = inlined_call_operand.vmem [shape: f32[16,6], index: 0, kind: input, shape index: {}]   ;;  %s4875_s1 = inlined_call_operand.vmem [shape: f32[6,128], index: 1, kind: input, shape index: {}]   ;;  %s4876_s2 = inlined_call_operand.hbm [shape: f32[2,128,128], index: 2, kind: input, shape index: {}]   ;;  %s4877_s3 = inlined_call_operand.hbm [shape: f32[3,128,128], index: 3, kind: input, shape index: {}]   ;;  %s4878_s4 = inlined_call_operand.vmem [shape: f32[3,128], index: 4, kind: input, shape index: {}]   ;;  %s4879_s5 = inlined_call_operand.hbm [shape: f32[128,128], index: 5, kind: input, shape index: {}]   ;;  %s4880_s6 = inlined_call_operand.vmem [shape: f32[1,128], index: 6, kind: input, shape index: {}]   ;;  %s4881_s7 = inlined_call_operand.hbm [shape: f32[16,128], index: 7, kind: output, shape index: {}]  }
   0x1   :  { %13 = vsyncpa [#allocation6], 0 }
   0x2   :  { %14 = vsyncpa [#allocation4], 0  ;;  %s3810_s24 = smov [#allocation5]   ;;  %s3811_s26 = smov [#allocation2]  }
   0x3   :  { %s36_s25 = sshll.u32 %s3810_s24, 4  ;;  %s24_s27 = sshll.u32 %s3811_s26, 4  ;;  %s37_s25 = int_to_ptr.vmem [resolvable:$true] %s36_s25  ;;  %s25_s27 = int_to_ptr.vmem [resolvable:$true] %s24_s27 }
   0x4   :  { %s3732_s28 = scalar_lea.vmem %s37_s25, 6144  ;;  %p3737_p1 = scmp.lt.s32.totalorder %s37_s25, %s37_s25 }
   0x5   :  { %p3733_p0 = scmp.ne.s32.totalorder %s37_s25, %s3732_s28  ;;  %p3738_p2 = scmp.lt.s32.totalorder %s3732_s28, %s3732_s28 }
   0x7   :  { %p3739_p3 = por %p3738_p2, %p3737_p1 }
   0x9   :  { %p3740_p4 = pnand %p3739_p3, %p3733_p0 }
   0xb   :  { %3743 = shalt.err (!%p3740_p4)
}
   0xc   :  { %s3812_s29 = smov 128   ;;  %s3813_s30 = smov 8  }
   0xd   :  { %42 = dma.hbm_to_vmem [thread:$0]  %s4877_s3, 6144, %s37_s25, [#allocation6], %s3812_s29, %s3812_s29, %s3813_s30  }
   0xe   :  { %s3752_s10 = scalar_lea.vmem %s25_s27, 4096  ;;  %p3757_p6 = scmp.lt.s32.totalorder %s25_s27, %s25_s27 }
   0xf   :  { %p3753_p5 = scmp.ne.s32.totalorder %s25_s27, %s3752_s10  ;;  %p3758_p7 = scmp.lt.s32.totalorder %s3752_s10, %s3752_s10 }
  0x11   :  { %p3759_p8 = por %p3758_p7, %p3757_p6 }
  0x13   :  { %p3760_p9 = pnand %p3759_p8, %p3753_p5 }
  0x15   :  { %3763 = shalt.err (!%p3760_p9)
}
  0x16   :  { %30 = dma.hbm_to_vmem [thread:$0]  %s4876_s2, 4096, %s25_s27, [#allocation3], %s3812_s29, %s3812_s29, %s3813_s30  }
  0x17   :  { %s3814_s13 = smov [#allocation7]  }
  0x18   :  { %s50_s14 = sshll.u32 %s3814_s13, 4  ;;  %s51_s14 = int_to_ptr.vmem [resolvable:$true] %s50_s14 }
  0x19   :  { %s3772_s15 = scalar_lea.vmem %s51_s14, 2048  ;;  %p3777_p11 = scmp.lt.s32.totalorder %s51_s14, %s51_s14 }
  0x1a   :  { %p3773_p10 = scmp.ne.s32.totalorder %s51_s14, %s3772_s15  ;;  %p3778_p12 = scmp.lt.s32.totalorder %s3772_s15, %s3772_s15 }
  0x1c   :  { %p3779_p13 = por %p3778_p12, %p3777_p11 }
  0x1e   :  { %p3780_p0 = pnand %p3779_p13, %p3773_p10 }
  0x20   :  { %3783 = shalt.err (!%p3780_p0)
}
  0x21   :  { %56 = dma.hbm_to_vmem [thread:$0]  %s4879_s5, 2048, %s51_s14, [#allocation6], %s3812_s29, %s3812_s29, %s3813_s30  }
  0x22   :  { %3804 = dma.done.wait [#allocation3], 4096  }
  0x23   :  { %3805 = vsyncadd [#allocation3], 4294963200 }
  0x24   :  { %3806 = dma.done.wait [#allocation6], 8192  }
  0x25   :  { %3807 = vsyncadd [#allocation6], 4294959104  ;;  %v3815_v0 = vmov 0.0   ;;  %vm99_vm0 = vcmask 1045504   ;;  %vm92_vm1 = vcmask 48128   ;;  %v68_v2 = vld [vmem:[%s4874_s0] sm:$0xff] }
  0x26   :  { %2780 = vmatprep.subr.mxu1 %v3815_v0  ;;  %v70_v1 = vld [vmem:[%s4875_s1] sm:$0x3f]  ;;  %v69_v3 = vld [vmem:[%s4874_s0 + $0x8] sm:$0xff]  ;;  %2777 = vmatprep.mubr.msk.f32.mxu0 %vm92_vm1, %v68_v2  ;;  %v3887_v4 = vld [vmem:[#allocation5 + $0x78] sm:$0xff]  ;;  %vm3816_vm2 = vmmov 0   ;;  %vm183_vm3 = vcmask 1041409  }
  0x27   :  { %2775 = vmatprep.subr.msk.mxu0 %vm99_vm0, %v70_v1  ;;  %v3889_v5 = vld [vmem:[#allocation5 + $0x70] sm:$0xff]  ;;  %2781 = vmatpush3.msra.mxu1 %v3887_v4  ;;  %v3894_v6 = vld [vmem:[#allocation5 + $0x68] sm:$0xff]  ;;  %v3899_v7 = vld [vmem:[#allocation5 + $0x60] sm:$0xff]  ;;  %vm773_vm4 = vcmask 1040384   ;;  %vm776_vm5 = vcmask 1041408   ;;  %vm779_vm6 = vcmask 1042432  }
  0x28   :  { %2776 = vmatpush3.msk.msra.mxu0 %vm99_vm0, %v70_v1  ;;  %2782 = vmatprep.subr.mxu1 %v3815_v0  ;;  %v3905_v8 = vld [vmem:[#allocation5 + $0x58] sm:$0xff]  ;;  %v3911_v9 = vld [vmem:[#allocation5 + $0x50] sm:$0xff]  ;;  %v3925_v10 = vld [vmem:[#allocation5 + $0x48] sm:$0xff]  ;;  %vm782_vm7 = vcmask 1043456   ;;  %vm785_vm8 = vcmask 1044480   ;;  %vm790_vm9 = vcmask 1046528  }
  0x29   :  { %2778 = vmatmul.mubr.msk.f32.vlgmr.msra.gmra.mxu0 %vm92_vm1, %v69_v3  ;;  %2783 = vmatpush3.msra.mxu1 %v3889_v5  ;;  %v3930_v11 = vld [vmem:[#allocation5 + $0x40] sm:$0xff]  ;;  %v3936_v12 = vld [vmem:[#allocation5 + $0x38] sm:$0xff]  ;;  %v3940_v13 = vld [vmem:[#allocation5 + $0x30] sm:$0xff]  ;;  %s3817_s26 = smov [#allocation8]  }
  0x2a   :  { %2815 = vmatprep.subr.mxu0 %v3815_v0  ;;  %2784 = vmatprep.subr.mxu1 %v3815_v0  ;;  %v3944_v14 = vld [vmem:[#allocation5 + $0x28] sm:$0xff]  ;;  %v3951_v15 = vld [vmem:[#allocation5 + $0x20] sm:$0xff]  ;;  %v3957_v16 = vld [vmem:[#allocation5 + $0x18] sm:$0xff]  ;;  %s2341_s27 = sshll.u32 %s3817_s26, 4  ;;  %s2342_s27 = int_to_ptr.vmem [resolvable:$true] %s2341_s27 }
  0x2b   :  { %2816 = vmatpush3.msra.mxu0 %v3887_v4  ;;  %2785 = vmatpush3.msra.mxu1 %v3894_v6  ;;  %v3963_v17 = vld [vmem:[#allocation5 + $0x10] sm:$0xff]  ;;  %v3969_v18 = vld [vmem:[#allocation5 + $0x8] sm:$0xff]  ;;  %v3975_v19 = vld [vmem:[#allocation5] sm:$0xff]  ;;  %s3784_s28 = scalar_lea.vmem %s2342_s27, 256  ;;  %p3789_p2 = scmp.lt.s32.totalorder %s2342_s27, %s2342_s27 }
  0x2c   :  { %2817 = vmatprep.subr.mxu0 %v3815_v0  ;;  %2786 = vmatprep.subr.mxu1 %v3815_v0  ;;  %v2354_v20 = vld [vmem:[%s4878_s4] ss:$0 sm:$0xff]  ;;  %p3785_p1 = scmp.ne.s32.totalorder %s2342_s27, %s3784_s28  ;;  %p3790_p3 = scmp.lt.s32.totalorder %s3784_s28, %s3784_s28 }
  0x2d   :  { %2818 = vmatpush3.msra.mxu0 %v3889_v5  ;;  %2787 = vmatpush3.msra.mxu1 %v3899_v7 }
  0x2e   :  { %2819 = vmatprep.subr.mxu0 %v3815_v0  ;;  %2788 = vmatprep.subr.mxu1 %v3815_v0  ;;  %p3791_p4 = por %p3790_p3, %p3789_p2 }
  0x2f   :  { %2820 = vmatpush3.msra.mxu0 %v3894_v6  ;;  %2789 = vmatpush3.msra.mxu1 %v3905_v8 }
  0x30   :  { %2821 = vmatprep.subr.mxu0 %v3815_v0  ;;  %2790 = vmatprep.subr.mxu1 %v3815_v0  ;;  %p3792_p5 = pnand %p3791_p4, %p3785_p1 }
  0x31   :  { %2822 = vmatpush3.msra.mxu0 %v3899_v7  ;;  %2791 = vmatpush3.msra.mxu1 %v3911_v9 }
  0x32   :  { %2823 = vmatprep.subr.mxu0 %v3815_v0  ;;  %2792 = vmatprep.subr.mxu1 %v3815_v0 }
  0x33   :  { %2824 = vmatpush3.msra.mxu0 %v3905_v8  ;;  %2793 = vmatpush3.msra.mxu1 %v3925_v10 }
  0x34   :  { %2825 = vmatprep.subr.mxu0 %v3815_v0  ;;  %2794 = vmatprep.subr.mxu1 %v3815_v0 }
  0x35   :  { %2826 = vmatpush3.msra.mxu0 %v3911_v9  ;;  %2795 = vmatpush3.msra.mxu1 %v3930_v11 }
  0x36   :  { %2827 = vmatprep.subr.mxu0 %v3815_v0  ;;  %2796 = vmatprep.subr.mxu1 %v3815_v0 }
  0x37   :  { %2828 = vmatpush3.msra.mxu0 %v3925_v10  ;;  %2797 = vmatpush3.msra.mxu1 %v3936_v12 }
  0x38   :  { %2829 = vmatprep.subr.mxu0 %v3815_v0  ;;  %2798 = vmatprep.subr.mxu1 %v3815_v0 }
  0x39   :  { %2830 = vmatpush3.msra.mxu0 %v3930_v11  ;;  %2812 = vmatprep.mubr.msk.f32.mxu1 %vm3816_vm2, %v3815_v0 }
  0x3a   :  { %2831 = vmatprep.subr.mxu0 %v3815_v0  ;;  %2799 = vmatpush3.msra.mxu1 %v3940_v13 }
  0x3b   :  { %2832 = vmatpush3.msra.mxu0 %v3936_v12  ;;  %2800 = vmatprep.subr.mxu1 %v3815_v0 }
  0x3c   :  { %2833 = vmatprep.subr.mxu0 %v3815_v0  ;;  %2801 = vmatpush3.msra.mxu1 %v3944_v14 }
  0x3d   :  { %2834 = vmatpush3.msra.mxu0 %v3940_v13  ;;  %2802 = vmatprep.subr.mxu1 %v3815_v0 }
  0x3e   :  { %2835 = vmatprep.subr.mxu0 %v3815_v0  ;;  %2803 = vmatpush3.msra.mxu1 %v3951_v15 }
  0x3f   :  { %2836 = vmatpush3.msra.mxu0 %v3944_v14  ;;  %2804 = vmatprep.subr.mxu1 %v3815_v0 }
  0x40   :  { %2837 = vmatprep.subr.mxu0 %v3815_v0  ;;  %2805 = vmatpush3.msra.mxu1 %v3957_v16 }
  0x41   :  { %2838 = vmatpush3.msra.mxu0 %v3951_v15  ;;  %2806 = vmatprep.subr.mxu1 %v3815_v0 }
  0x42   :  { %2839 = vmatprep.subr.mxu0 %v3815_v0  ;;  %2807 = vmatpush3.msra.mxu1 %v3963_v17 }
  0x43   :  { %2840 = vmatpush3.msra.mxu0 %v3957_v16  ;;  %2808 = vmatprep.subr.mxu1 %v3815_v0 }
  0x44   :  { %2841 = vmatprep.subr.mxu0 %v3815_v0  ;;  %2809 = vmatpush3.msra.mxu1 %v3969_v18 }
  0x45   :  { %2842 = vmatpush3.msra.mxu0 %v3963_v17  ;;  %2810 = vmatprep.subr.mxu1 %v3815_v0 }
  0x46   :  { %2843 = vmatprep.subr.mxu0 %v3815_v0  ;;  %2811 = vmatpush3.msra.mxu1 %v3975_v19 }
  0x47   :  { %2844 = vmatpush3.msra.mxu0 %v3969_v18  ;;  %2847 = vmatprep.mubr.msk.f32.mxu0 %vm3816_vm2, %v3815_v0 }
  0x48   :  { %2845 = vmatprep.subr.mxu0 %v3815_v0  ;;  %2850 = vmatprep.subr.mxu1 %v3815_v0 }
  0x49   :  { %2846 = vmatpush3.msra.mxu0 %v3975_v19 }
  0x4a   :  { %2885 = vmatprep.subr.mxu0 %v3815_v0 }
  0xe9   :  { %v2779_v21 = vpop.f32.mrf.mxu0 }
  0xea   :  { %v3992_v22 = vadd.f32 %v2779_v21, %v2354_v20 }
  0xeb   :  { %v169_v23 = vpop.f32.mrf.mxu0 }
  0xec   :  { %v3994_v24 = vadd.f32 %v2354_v20, %v169_v23  ;;  %3628 = vtanh.f32 %v3992_v22 }
  0xee   :  { %3630 = vtanh.f32 %v3994_v24 }
  0xf9   :  { %v3998_v25 = vpop.eup %3628 }
  0xfa   :  { %v182_v26 = vrot.slane %v3998_v25, 7 }
  0xfb   :  { %v4001_v27 = vpop.eup %3630 }
  0xfc   :  { %v184_v28 = vsel %vm183_vm3, %v182_v26, %v4001_v27 }
  0xfd   :  { %2813 = vmatmul.mubr.f32.vlgmr.msra.gmra.mxu1 %v184_v28 }
  0xfe   :  { %2851 = vmatpush3.msra.mxu1 %v3887_v4  ;;  %2882 = vmatprep.mubr.msk.f32.mxu1 %vm3816_vm2, %v3815_v0 }
  0xff   :  { %2852 = vmatprep.subr.mxu1 %v3815_v0 }
 0x100   :  { %2853 = vmatpush3.msra.mxu1 %v3889_v5 }
 0x101   :  { %2854 = vmatprep.subr.mxu1 %v3815_v0 }
 0x102   :  { %2855 = vmatpush3.msra.mxu1 %v3894_v6 }
 0x103   :  { %2856 = vmatprep.subr.mxu1 %v3815_v0 }
 0x104   :  { %2857 = vmatpush3.msra.mxu1 %v3899_v7 }
 0x105   :  { %2858 = vmatprep.subr.mxu1 %v3815_v0 }
 0x106   :  { %2859 = vmatpush3.msra.mxu1 %v3905_v8 }
 0x107   :  { %2860 = vmatprep.subr.mxu1 %v3815_v0 }
 0x108   :  { %2861 = vmatpush3.msra.mxu1 %v3911_v9 }
 0x109   :  { %2862 = vmatprep.subr.mxu1 %v3815_v0 }
 0x10a   :  { %2863 = vmatpush3.msra.mxu1 %v3925_v10 }
 0x10b   :  { %2864 = vmatprep.subr.mxu1 %v3815_v0 }
 0x10c   :  { %2865 = vmatpush3.msra.mxu1 %v3930_v11 }
 0x10d   :  { %2866 = vmatprep.subr.mxu1 %v3815_v0 }
 0x10e   :  { %2867 = vmatpush3.msra.mxu1 %v3936_v12 }
 0x10f   :  { %2868 = vmatprep.subr.mxu1 %v3815_v0 }
 0x110   :  { %2869 = vmatpush3.msra.mxu1 %v3940_v13 }
 0x111   :  { %2870 = vmatprep.subr.mxu1 %v3815_v0 }
 0x112   :  { %2871 = vmatpush3.msra.mxu1 %v3944_v14 }
 0x113   :  { %2872 = vmatprep.subr.mxu1 %v3815_v0 }
 0x114   :  { %2873 = vmatpush3.msra.mxu1 %v3951_v15 }
 0x115   :  { %2874 = vmatprep.subr.mxu1 %v3815_v0 }
 0x116   :  { %2875 = vmatpush3.msra.mxu1 %v3957_v16 }
 0x117   :  { %2876 = vmatprep.subr.mxu1 %v3815_v0 }
 0x118   :  { %2877 = vmatpush3.msra.mxu1 %v3963_v17 }
 0x119   :  { %2878 = vmatprep.subr.mxu1 %v3815_v0 }
 0x11a   :  { %2879 = vmatpush3.msra.mxu1 %v3969_v18 }
 0x11b   :  { %2880 = vmatprep.subr.mxu1 %v3815_v0 }
 0x11c   :  { %2881 = vmatpush3.msra.mxu1 %v3975_v19 }
 0x11d   :  { %2920 = vmatprep.subr.mxu1 %v3815_v0 }
 0x1bd   :  { %v252_v29 = vpop.f32.mrf.mxu1 }
 0x1be   :  { %v257_v30 = vrot.slane %v252_v29, 7  ;;  %v261_v33 = vadd.f32 %v252_v29, %v3992_v22 }
 0x1bf   :  { %v2814_v31 = vpop.f32.mrf.mxu1 }
 0x1c0   :  { %v260_v32 = vadd.f32 %v257_v30, %v3994_v24 }
 0x1c2   :  { %3632 = vtanh.f32 %v260_v32 }
 0x1c3   :  { %3634 = vtanh.f32 %v261_v33 }
 0x1cf   :  { %v3633_v34 = vpop.eup %3632 }
 0x1d0   :  { %v266_v35 = vrot.slane %v3633_v34, 1  ;;  %v3635_v36 = vpop.eup %3634  ;;  %v774_v45 = vsel %vm773_vm4, %v4001_v27, %v3633_v34  ;;  %v805_v34 = vld [vmem:[#allocation2 + $0x60] sm:$0xff] }
 0x1d1   :  { %v775_v49 = vsel %vm773_vm4, %v3998_v25, %v3635_v36 }
 0x1d2   :  { %v267_v37 = vsel %vm183_vm3, %v3635_v36, %v266_v35  ;;  %v804_v35 = vld [vmem:[#allocation2 + $0x58] sm:$0xff]  ;;  %v803_v36 = vld [vmem:[#allocation2 + $0x50] sm:$0xff] }
 0x1d3   :  { %2848 = vmatmul.mubr.f32.vlgmr.msra.gmra.mxu0 %v267_v37 }
 0x1d4   :  { %2886 = vmatpush3.msra.mxu0 %v3887_v4  ;;  %2917 = vmatprep.mubr.msk.f32.mxu0 %vm3816_vm2, %v3815_v0 }
 0x1d5   :  { %2887 = vmatprep.subr.mxu0 %v3815_v0 }
 0x1d6   :  { %2888 = vmatpush3.msra.mxu0 %v3889_v5 }
 0x1d7   :  { %2889 = vmatprep.subr.mxu0 %v3815_v0 }
 0x1d8   :  { %2890 = vmatpush3.msra.mxu0 %v3894_v6 }
 0x1d9   :  { %2891 = vmatprep.subr.mxu0 %v3815_v0 }
 0x1da   :  { %2892 = vmatpush3.msra.mxu0 %v3899_v7 }
 0x1db   :  { %2893 = vmatprep.subr.mxu0 %v3815_v0 }
 0x1dc   :  { %2894 = vmatpush3.msra.mxu0 %v3905_v8 }
 0x1dd   :  { %2895 = vmatprep.subr.mxu0 %v3815_v0 }
 0x1de   :  { %2896 = vmatpush3.msra.mxu0 %v3911_v9 }
 0x1df   :  { %2897 = vmatprep.subr.mxu0 %v3815_v0 }
 0x1e0   :  { %2898 = vmatpush3.msra.mxu0 %v3925_v10 }
 0x1e1   :  { %2899 = vmatprep.subr.mxu0 %v3815_v0 }
 0x1e2   :  { %2900 = vmatpush3.msra.mxu0 %v3930_v11 }
 0x1e3   :  { %2901 = vmatprep.subr.mxu0 %v3815_v0 }
 0x1e4   :  { %2902 = vmatpush3.msra.mxu0 %v3936_v12 }
 0x1e5   :  { %2903 = vmatprep.subr.mxu0 %v3815_v0 }
 0x1e6   :  { %2904 = vmatpush3.msra.mxu0 %v3940_v13 }
 0x1e7   :  { %2905 = vmatprep.subr.mxu0 %v3815_v0 }
 0x1e8   :  { %2906 = vmatpush3.msra.mxu0 %v3944_v14 }
 0x1e9   :  { %2907 = vmatprep.subr.mxu0 %v3815_v0 }
 0x1ea   :  { %2908 = vmatpush3.msra.mxu0 %v3951_v15 }
 0x1eb   :  { %2909 = vmatprep.subr.mxu0 %v3815_v0 }
 0x1ec   :  { %2910 = vmatpush3.msra.mxu0 %v3957_v16 }
 0x1ed   :  { %2911 = vmatprep.subr.mxu0 %v3815_v0 }
 0x1ee   :  { %2912 = vmatpush3.msra.mxu0 %v3963_v17 }
 0x1ef   :  { %2913 = vmatprep.subr.mxu0 %v3815_v0 }
 0x1f0   :  { %2914 = vmatpush3.msra.mxu0 %v3969_v18 }
 0x1f1   :  { %2915 = vmatprep.subr.mxu0 %v3815_v0 }
 0x1f2   :  { %2916 = vmatpush3.msra.mxu0 %v3975_v19 }
 0x1f3   :  { %2955 = vmatprep.subr.mxu0 %v3815_v0 }
 0x293   :  { %v335_v38 = vpop.f32.mrf.mxu0 }
 0x294   :  { %v340_v39 = vrot.slane %v335_v38, 6  ;;  %v341_v40 = vrot.slane %v335_v38, 7 }
 0x295   :  { %v2849_v41 = vpop.f32.mrf.mxu0 }
 0x296   :  { %v344_v42 = vadd.f32 %v340_v39, %v3994_v24  ;;  %v345_v43 = vadd.f32 %v341_v40, %v3992_v22 }
 0x298   :  { %3636 = vtanh.f32 %v344_v42 }
 0x299   :  { %3638 = vtanh.f32 %v345_v43 }
 0x2a5   :  { %v3637_v44 = vpop.eup %3636 }
 0x2a6   :  { %v3639_v46 = vpop.eup %3638  ;;  %v350_v47 = vrot.slane %v3637_v44, 2  ;;  %v777_v48 = vsel %vm776_vm5, %v774_v45, %v3637_v44 }
 0x2a7   :  { %v351_v50 = vrot.slane %v3639_v46, 1  ;;  %v778_v51 = vsel %vm776_vm5, %v775_v49, %v3639_v46 }
 0x2a9   :  { %v352_v52 = vsel %vm183_vm3, %v351_v50, %v350_v47  ;;  %v802_v50 = vld [vmem:[#allocation2 + $0x48] sm:$0xff] }
 0x2aa   :  { %2883 = vmatmul.mubr.f32.vlgmr.msra.gmra.mxu1 %v352_v52  ;;  %v800_v52 = vld [vmem:[#allocation2 + $0x38] sm:$0xff] }
 0x2ab   :  { %2921 = vmatpush3.msra.mxu1 %v3887_v4  ;;  %2952 = vmatprep.mubr.msk.f32.mxu1 %vm3816_vm2, %v3815_v0 }
 0x2ac   :  { %2922 = vmatprep.subr.mxu1 %v3815_v0 }
 0x2ad   :  { %2923 = vmatpush3.msra.mxu1 %v3889_v5 }
 0x2ae   :  { %2924 = vmatprep.subr.mxu1 %v3815_v0 }
 0x2af   :  { %2925 = vmatpush3.msra.mxu1 %v3894_v6 }
 0x2b0   :  { %2926 = vmatprep.subr.mxu1 %v3815_v0 }
 0x2b1   :  { %2927 = vmatpush3.msra.mxu1 %v3899_v7 }
 0x2b2   :  { %2928 = vmatprep.subr.mxu1 %v3815_v0 }
 0x2b3   :  { %2929 = vmatpush3.msra.mxu1 %v3905_v8 }
 0x2b4   :  { %2930 = vmatprep.subr.mxu1 %v3815_v0 }
 0x2b5   :  { %2931 = vmatpush3.msra.mxu1 %v3911_v9 }
 0x2b6   :  { %2932 = vmatprep.subr.mxu1 %v3815_v0 }
 0x2b7   :  { %2933 = vmatpush3.msra.mxu1 %v3925_v10 }
 0x2b8   :  { %2934 = vmatprep.subr.mxu1 %v3815_v0 }
 0x2b9   :  { %2935 = vmatpush3.msra.mxu1 %v3930_v11 }
 0x2ba   :  { %2936 = vmatprep.subr.mxu1 %v3815_v0 }
 0x2bb   :  { %2937 = vmatpush3.msra.mxu1 %v3936_v12 }
 0x2bc   :  { %2938 = vmatprep.subr.mxu1 %v3815_v0 }
 0x2bd   :  { %2939 = vmatpush3.msra.mxu1 %v3940_v13 }
 0x2be   :  { %2940 = vmatprep.subr.mxu1 %v3815_v0 }
 0x2bf   :  { %2941 = vmatpush3.msra.mxu1 %v3944_v14 }
 0x2c0   :  { %2942 = vmatprep.subr.mxu1 %v3815_v0 }
 0x2c1   :  { %2943 = vmatpush3.msra.mxu1 %v3951_v15 }
 0x2c2   :  { %2944 = vmatprep.subr.mxu1 %v3815_v0 }
 0x2c3   :  { %2945 = vmatpush3.msra.mxu1 %v3957_v16 }
 0x2c4   :  { %2946 = vmatprep.subr.mxu1 %v3815_v0 }
 0x2c5   :  { %2947 = vmatpush3.msra.mxu1 %v3963_v17 }
 0x2c6   :  { %2948 = vmatprep.subr.mxu1 %v3815_v0 }
 0x2c7   :  { %2949 = vmatpush3.msra.mxu1 %v3969_v18 }
 0x2c8   :  { %2950 = vmatprep.subr.mxu1 %v3815_v0 }
 0x2c9   :  { %2951 = vmatpush3.msra.mxu1 %v3975_v19 }
 0x2ca   :  { %2990 = vmatprep.subr.mxu1 %v3815_v0 }
 0x36a   :  { %v420_v53 = vpop.f32.mrf.mxu1 }
 0x36b   :  { %v425_v54 = vrot.slane %v420_v53, 5  ;;  %v426_v55 = vrot.slane %v420_v53, 6  ;;  %v799_v53 = vld [vmem:[#allocation2 + $0x30] sm:$0xff] }
 0x36c   :  { %v2884_v56 = vpop.f32.mrf.mxu1 }
 0x36d   :  { %v429_v57 = vadd.f32 %v425_v54, %v3994_v24  ;;  %v430_v58 = vadd.f32 %v426_v55, %v3992_v22  ;;  %v798_v54 = vld [vmem:[#allocation2 + $0x28] sm:$0xff]  ;;  %v797_v55 = vld [vmem:[#allocation2 + $0x20] sm:$0xff]  ;;  %v796_v56 = vld [vmem:[#allocation2 + $0x18] sm:$0xff] }
 0x36f   :  { %3640 = vtanh.f32 %v429_v57  ;;  %v795_v57 = vld [vmem:[#allocation2 + $0x10] sm:$0xff] }
 0x370   :  { %3642 = vtanh.f32 %v430_v58  ;;  %v794_v58 = vld [vmem:[#allocation2 + $0x8] sm:$0xff] }
 0x37c   :  { %v3641_v59 = vpop.eup %3640 }
 0x37d   :  { %v3643_v60 = vpop.eup %3642  ;;  %v435_v61 = vrot.slane %v3641_v59, 3  ;;  %v780_v62 = vsel %vm779_vm6, %v777_v48, %v3641_v59  ;;  %v793_v59 = vld [vmem:[#allocation2] sm:$0xff] }
 0x37e   :  { %v436_v63 = vrot.slane %v3643_v60, 2  ;;  %v781_v1 = vsel %vm779_vm6, %v778_v51, %v3643_v60  ;;  %v801_v51 = vld [vmem:[#allocation2 + $0x40] sm:$0xff]  ;;  %v4212_v60 = vld [vmem:[#allocation5 + $0xf8] sm:$0xff] }
 0x380   :  { %v437_v2 = vsel %vm183_vm3, %v436_v63, %v435_v61  ;;  %v4214_v61 = vld [vmem:[#allocation5 + $0xf0] sm:$0xff]  ;;  %v4223_v63 = vld [vmem:[#allocation5 + $0xe0] sm:$0xff] }
 0x381   :  { %2918 = vmatmul.mubr.f32.vlgmr.msra.gmra.mxu0 %v437_v2  ;;  %v4231_v2 = vld [vmem:[#allocation5 + $0xd0] sm:$0xff] }
 0x382   :  { %2956 = vmatpush3.msra.mxu0 %v3887_v4  ;;  %2987 = vmatprep.mubr.msk.f32.mxu0 %vm3816_vm2, %v3815_v0 }
 0x383   :  { %2957 = vmatprep.subr.mxu0 %v3815_v0 }
 0x384   :  { %2958 = vmatpush3.msra.mxu0 %v3889_v5 }
 0x385   :  { %2959 = vmatprep.subr.mxu0 %v3815_v0 }
 0x386   :  { %2960 = vmatpush3.msra.mxu0 %v3894_v6 }
 0x387   :  { %2961 = vmatprep.subr.mxu0 %v3815_v0 }
 0x388   :  { %2962 = vmatpush3.msra.mxu0 %v3899_v7 }
 0x389   :  { %2963 = vmatprep.subr.mxu0 %v3815_v0 }
 0x38a   :  { %2964 = vmatpush3.msra.mxu0 %v3905_v8 }
 0x38b   :  { %2965 = vmatprep.subr.mxu0 %v3815_v0 }
 0x38c   :  { %2966 = vmatpush3.msra.mxu0 %v3911_v9 }
 0x38d   :  { %2967 = vmatprep.subr.mxu0 %v3815_v0 }
 0x38e   :  { %2968 = vmatpush3.msra.mxu0 %v3925_v10 }
 0x38f   :  { %2969 = vmatprep.subr.mxu0 %v3815_v0 }
 0x390   :  { %2970 = vmatpush3.msra.mxu0 %v3930_v11 }
 0x391   :  { %2971 = vmatprep.subr.mxu0 %v3815_v0 }
 0x392   :  { %2972 = vmatpush3.msra.mxu0 %v3936_v12 }
 0x393   :  { %2973 = vmatprep.subr.mxu0 %v3815_v0 }
 0x394   :  { %2974 = vmatpush3.msra.mxu0 %v3940_v13 }
 0x395   :  { %2975 = vmatprep.subr.mxu0 %v3815_v0 }
 0x396   :  { %2976 = vmatpush3.msra.mxu0 %v3944_v14 }
 0x397   :  { %2977 = vmatprep.subr.mxu0 %v3815_v0 }
 0x398   :  { %2978 = vmatpush3.msra.mxu0 %v3951_v15 }
 0x399   :  { %2979 = vmatprep.subr.mxu0 %v3815_v0 }
 0x39a   :  { %2980 = vmatpush3.msra.mxu0 %v3957_v16 }
 0x39b   :  { %2981 = vmatprep.subr.mxu0 %v3815_v0 }
 0x39c   :  { %2982 = vmatpush3.msra.mxu0 %v3963_v17 }
 0x39d   :  { %2983 = vmatprep.subr.mxu0 %v3815_v0 }
 0x39e   :  { %2984 = vmatpush3.msra.mxu0 %v3969_v18 }
 0x39f   :  { %2985 = vmatprep.subr.mxu0 %v3815_v0 }
 0x3a0   :  { %2986 = vmatpush3.msra.mxu0 %v3975_v19 }
 0x441   :  { %v505_v3 = vpop.f32.mrf.mxu0 }
 0x442   :  { %v510_v20 = vrot.slane %v505_v3, 4  ;;  %v511_v21 = vrot.slane %v505_v3, 5 }
 0x443   :  { %v2919_v23 = vpop.f32.mrf.mxu0 }
 0x444   :  { %v514_v25 = vadd.f32 %v510_v20, %v3994_v24  ;;  %v515_v26 = vadd.f32 %v511_v21, %v3992_v22 }
 0x446   :  { %3644 = vtanh.f32 %v514_v25 }
 0x447   :  { %3646 = vtanh.f32 %v515_v26 }
 0x453   :  { %v3645_v27 = vpop.eup %3644 }
 0x454   :  { %v3647_v28 = vpop.eup %3646  ;;  %v520_v29 = vrot.slane %v3645_v27, 4  ;;  %v783_v30 = vsel %vm782_vm7, %v780_v62, %v3645_v27  ;;  %v4219_v62 = vld [vmem:[#allocation5 + $0xe8] sm:$0xff] }
 0x455   :  { %v521_v31 = vrot.slane %v3647_v28, 3  ;;  %v784_v32 = vsel %vm782_vm7, %v781_v1, %v3647_v28  ;;  %v4227_v1 = vld [vmem:[#allocation5 + $0xd8] sm:$0xff] }
 0x457   :  { %v522_v33 = vsel %vm183_vm3, %v521_v31, %v520_v29  ;;  %v4268_v31 = vld [vmem:[#allocation5 + $0xb8] sm:$0xff] }
 0x458   :  { %2953 = vmatmul.mubr.f32.vlgmr.msra.gmra.mxu1 %v522_v33  ;;  %v4276_v33 = vld [vmem:[#allocation5 + $0xa8] sm:$0xff] }
 0x459   :  { %2991 = vmatpush3.msra.mxu1 %v3887_v4  ;;  %3022 = vmatprep.mubr.msk.f32.mxu1 %vm3816_vm2, %v3815_v0 }
 0x45a   :  { %2992 = vmatprep.subr.mxu1 %v3815_v0 }
 0x45b   :  { %2993 = vmatpush3.msra.mxu1 %v3889_v5 }
 0x45c   :  { %2994 = vmatprep.subr.mxu1 %v3815_v0 }
 0x45d   :  { %2995 = vmatpush3.msra.mxu1 %v3894_v6 }
 0x45e   :  { %2996 = vmatprep.subr.mxu1 %v3815_v0 }
 0x45f   :  { %2997 = vmatpush3.msra.mxu1 %v3899_v7 }
 0x460   :  { %2998 = vmatprep.subr.mxu1 %v3815_v0 }
 0x461   :  { %2999 = vmatpush3.msra.mxu1 %v3905_v8 }
 0x462   :  { %3000 = vmatprep.subr.mxu1 %v3815_v0 }
 0x463   :  { %3001 = vmatpush3.msra.mxu1 %v3911_v9 }
 0x464   :  { %3002 = vmatprep.subr.mxu1 %v3815_v0 }
 0x465   :  { %3003 = vmatpush3.msra.mxu1 %v3925_v10 }
 0x466   :  { %3004 = vmatprep.subr.mxu1 %v3815_v0 }
 0x467   :  { %3005 = vmatpush3.msra.mxu1 %v3930_v11 }
 0x468   :  { %3006 = vmatprep.subr.mxu1 %v3815_v0 }
 0x469   :  { %3007 = vmatpush3.msra.mxu1 %v3936_v12 }
 0x46a   :  { %3008 = vmatprep.subr.mxu1 %v3815_v0 }
 0x46b   :  { %3009 = vmatpush3.msra.mxu1 %v3940_v13 }
 0x46c   :  { %3010 = vmatprep.subr.mxu1 %v3815_v0 }
 0x46d   :  { %3011 = vmatpush3.msra.mxu1 %v3944_v14 }
 0x46e   :  { %3012 = vmatprep.subr.mxu1 %v3815_v0 }
 0x46f   :  { %3013 = vmatpush3.msra.mxu1 %v3951_v15 }
 0x470   :  { %3014 = vmatprep.subr.mxu1 %v3815_v0 }
 0x471   :  { %3015 = vmatpush3.msra.mxu1 %v3957_v16 }
 0x472   :  { %3016 = vmatprep.subr.mxu1 %v3815_v0 }
 0x473   :  { %3017 = vmatpush3.msra.mxu1 %v3963_v17  ;;  %v808_v17 = vld [vmem:[#allocation2 + $0x78] sm:$0xff] }
 0x474   :  { %3018 = vmatprep.subr.mxu1 %v3815_v0  ;;  %3025 = vmatprep.subr.mxu0 %v808_v17 }
 0x475   :  { %3019 = vmatpush3.msra.mxu1 %v3969_v18  ;;  %v807_v18 = vld [vmem:[#allocation2 + $0x70] sm:$0xff] }
 0x476   :  { %3020 = vmatprep.subr.mxu1 %v3815_v0 }
 0x477   :  { %3021 = vmatpush3.msra.mxu1 %v3975_v19  ;;  %v806_v19 = vld [vmem:[#allocation2 + $0x68] sm:$0xff] }
 0x478   :  { %3060 = vmatprep.subr.mxu1 %v3815_v0 }
 0x518   :  { %v590_v4 = vpop.f32.mrf.mxu1 }
 0x519   :  { %v595_v5 = vrot.slane %v590_v4, 3  ;;  %v596_v6 = vrot.slane %v590_v4, 4  ;;  %v4282_v4 = vld [vmem:[#allocation5 + $0xa0] sm:$0xff] }
 0x51a   :  { %v2954_v7 = vpop.f32.mrf.mxu1 }
 0x51b   :  { %v599_v8 = vadd.f32 %v595_v5, %v3994_v24  ;;  %v600_v9 = vadd.f32 %v596_v6, %v3992_v22  ;;  %v4288_v5 = vld [vmem:[#allocation5 + $0x98] sm:$0xff]  ;;  %v4294_v6 = vld [vmem:[#allocation5 + $0x90] sm:$0xff]  ;;  %v4300_v7 = vld [vmem:[#allocation5 + $0x88] sm:$0xff] }
 0x51d   :  { %3648 = vtanh.f32 %v599_v8  ;;  %v4306_v8 = vld [vmem:[#allocation5 + $0x80] sm:$0xff] }
 0x51e   :  { %3650 = vtanh.f32 %v600_v9  ;;  %v2358_v9 = vld [vmem:[%s4878_s4 + $0x1] ss:$0 sm:$0xff] }
 0x52a   :  { %v3649_v10 = vpop.eup %3648 }
 0x52b   :  { %v3651_v11 = vpop.eup %3650  ;;  %v605_v12 = vrot.slane %v3649_v10, 5  ;;  %v786_v13 = vsel %vm785_vm8, %v783_v30, %v3649_v10 }
 0x52c   :  { %v606_v14 = vrot.slane %v3651_v11, 4  ;;  %v787_v15 = vsel %vm785_vm8, %v784_v32, %v3651_v11  ;;  %v4270_v32 = vld [vmem:[#allocation5 + $0xb0] sm:$0xff] }
 0x52e   :  { %v607_v16 = vsel %vm183_vm3, %v606_v14, %v605_v12 }
 0x52f   :  { %2988 = vmatmul.mubr.f32.vlgmr.msra.gmra.mxu0 %v607_v16 }
 0x530   :  { %3026 = vmatpush3.msra.mxu0 %v808_v17 }
 0x531   :  { %3027 = vmatprep.subr.mxu0 %v807_v18 }
 0x532   :  { %3028 = vmatpush3.msra.mxu0 %v807_v18 }
 0x533   :  { %3029 = vmatprep.subr.mxu0 %v806_v19 }
 0x534   :  { %3030 = vmatpush3.msra.mxu0 %v806_v19 }
 0x535   :  { %3031 = vmatprep.subr.mxu0 %v805_v34 }
 0x536   :  { %3032 = vmatpush3.msra.mxu0 %v805_v34 }
 0x537   :  { %3033 = vmatprep.subr.mxu0 %v804_v35 }
 0x538   :  { %3034 = vmatpush3.msra.mxu0 %v804_v35 }
 0x539   :  { %3035 = vmatprep.subr.mxu0 %v803_v36 }
 0x53a   :  { %3036 = vmatpush3.msra.mxu0 %v803_v36 }
 0x53b   :  { %3037 = vmatprep.subr.mxu0 %v802_v50 }
 0x53c   :  { %3038 = vmatpush3.msra.mxu0 %v802_v50 }
 0x53d   :  { %3039 = vmatprep.subr.mxu0 %v801_v51 }
 0x53e   :  { %3040 = vmatpush3.msra.mxu0 %v801_v51 }
 0x53f   :  { %3041 = vmatprep.subr.mxu0 %v800_v52 }
 0x540   :  { %3042 = vmatpush3.msra.mxu0 %v800_v52 }
 0x541   :  { %3043 = vmatprep.subr.mxu0 %v799_v53 }
 0x542   :  { %3044 = vmatpush3.msra.mxu0 %v799_v53 }
 0x543   :  { %3045 = vmatprep.subr.mxu0 %v798_v54 }
 0x544   :  { %3046 = vmatpush3.msra.mxu0 %v798_v54 }
 0x545   :  { %3047 = vmatprep.subr.mxu0 %v797_v55 }
 0x546   :  { %3048 = vmatpush3.msra.mxu0 %v797_v55 }
 0x547   :  { %3049 = vmatprep.subr.mxu0 %v796_v56 }
 0x548   :  { %3050 = vmatpush3.msra.mxu0 %v796_v56 }
 0x549   :  { %3051 = vmatprep.subr.mxu0 %v795_v57 }
 0x54a   :  { %3052 = vmatpush3.msra.mxu0 %v795_v57 }
 0x54b   :  { %3053 = vmatprep.subr.mxu0 %v794_v58 }
 0x54c   :  { %3054 = vmatpush3.msra.mxu0 %v794_v58 }
 0x54d   :  { %3055 = vmatprep.subr.mxu0 %v793_v59 }
 0x54e   :  { %3056 = vmatpush3.msra.mxu0 %v793_v59 }
 0x54f   :  { %3095 = vmatprep.subr.mxu0 %v3815_v0 }
 0x5ef   :  { %v675_v37 = vpop.f32.mrf.mxu0 }
 0x5f0   :  { %v680_v38 = vrot.slane %v675_v37, 2  ;;  %v681_v39 = vrot.slane %v675_v37, 3 }
 0x5f1   :  { %v2989_v40 = vpop.f32.mrf.mxu0 }
 0x5f2   :  { %v684_v41 = vadd.f32 %v680_v38, %v3994_v24  ;;  %v685_v42 = vadd.f32 %v681_v39, %v3992_v22 }
 0x5f4   :  { %3652 = vtanh.f32 %v684_v41 }
 0x5f5   :  { %3654 = vtanh.f32 %v685_v42 }
 0x601   :  { %v3653_v43 = vpop.eup %3652 }
 0x602   :  { %v3655_v44 = vpop.eup %3654  ;;  %v690_v45 = vrot.slane %v3653_v43, 6  ;;  %v4204_v46 = vsel %vm99_vm0, %v786_v13, %v3653_v43 }
 0x603   :  { %v691_v47 = vrot.slane %v3655_v44, 5  ;;  %v4207_v48 = vsel %vm99_vm0, %v787_v15, %v3655_v44 }
 0x605   :  { %v692_v49 = vsel %vm183_vm3, %v691_v47, %v690_v45 }
 0x606   :  { %3023 = vmatmul.mubr.f32.vlgmr.msra.gmra.mxu1 %v692_v49 }
 0x607   :  { %3092 = vmatprep.mubr.msk.f32.mxu1 %vm3816_vm2, %v3815_v0  ;;  %3061 = vmatpush3.msra.mxu1 %v4212_v60 }
 0x608   :  { %3062 = vmatprep.subr.mxu1 %v3815_v0 }
 0x609   :  { %3063 = vmatpush3.msra.mxu1 %v4214_v61 }
 0x60a   :  { %3064 = vmatprep.subr.mxu1 %v3815_v0 }
 0x60b   :  { %3065 = vmatpush3.msra.mxu1 %v4219_v62 }
 0x60c   :  { %3066 = vmatprep.subr.mxu1 %v3815_v0 }
 0x60d   :  { %3067 = vmatpush3.msra.mxu1 %v4223_v63 }
 0x60e   :  { %3068 = vmatprep.subr.mxu1 %v3815_v0 }
 0x60f   :  { %3069 = vmatpush3.msra.mxu1 %v4227_v1 }
 0x610   :  { %3070 = vmatprep.subr.mxu1 %v3815_v0 }
 0x611   :  { %3071 = vmatpush3.msra.mxu1 %v4231_v2 }
 0x612   :  { %3072 = vmatprep.subr.mxu1 %v3815_v0 }
 0x6c6   :  { %v760_v3 = vpop.f32.mrf.mxu1 }
 0x6c7   :  { %v765_v20 = vrot.slane %v760_v3, 1  ;;  %v766_v21 = vrot.slane %v760_v3, 2 }
 0x6c8   :  { %v3024_v23 = vpop.f32.mrf.mxu1 }
 0x6c9   :  { %v769_v25 = vadd.f32 %v765_v20, %v3994_v24  ;;  %v770_v26 = vadd.f32 %v766_v21, %v3992_v22  ;;  %v4257_v22 = vld [vmem:[#allocation5 + $0xc8] sm:$0xff]  ;;  %v4262_v24 = vld [vmem:[#allocation5 + $0xc0] sm:$0xff] }
 0x6ca   :  { %3073 = vmatpush3.msra.mxu1 %v4257_v22 }
 0x6cb   :  { %3656 = vtanh.f32 %v769_v25  ;;  %3074 = vmatprep.subr.mxu1 %v3815_v0 }
 0x6cc   :  { %3658 = vtanh.f32 %v770_v26  ;;  %3075 = vmatpush3.msra.mxu1 %v4262_v24 }
 0x6cd   :  { %3076 = vmatprep.subr.mxu1 %v3815_v0 }
 0x6ce   :  { %3077 = vmatpush3.msra.mxu1 %v4268_v31 }
 0x6cf   :  { %3078 = vmatprep.subr.mxu1 %v3815_v0 }
 0x6d0   :  { %3079 = vmatpush3.msra.mxu1 %v4270_v32 }
 0x6d1   :  { %3080 = vmatprep.subr.mxu1 %v3815_v0 }
 0x6d2   :  { %3081 = vmatpush3.msra.mxu1 %v4276_v33 }
 0x6d3   :  { %3082 = vmatprep.subr.mxu1 %v3815_v0 }
 0x6d4   :  { %3083 = vmatpush3.msra.mxu1 %v4282_v4 }
 0x6d5   :  { %3084 = vmatprep.subr.mxu1 %v3815_v0 }
 0x6d6   :  { %3085 = vmatpush3.msra.mxu1 %v4288_v5 }
 0x6d7   :  { %3086 = vmatprep.subr.mxu1 %v3815_v0 }
 0x6d8   :  { %v3657_v27 = vpop.eup %3656  ;;  %3087 = vmatpush3.msra.mxu1 %v4294_v6 }
 0x6d9   :  { %v3659_v28 = vpop.eup %3658  ;;  %v791_v29 = vsel %vm790_vm9, %v4204_v46, %v3657_v27  ;;  %3088 = vmatprep.subr.mxu1 %v3815_v0 }
 0x6da   :  { %3057 = vmatprep.mubr.f32.mxu0 %v791_v29  ;;  %v792_v30 = vsel %vm790_vm9, %v4207_v48, %v3659_v28  ;;  %3089 = vmatpush3.msra.mxu1 %v4300_v7 }
 0x6db   :  { %3058 = vmatmul.mubr.f32.vlgmr.msra.gmra.mxu0 %v792_v30  ;;  %3090 = vmatprep.subr.mxu1 %v3815_v0 }
 0x6dc   :  { %3096 = vmatpush3.msra.mxu0 %v4212_v60  ;;  %3127 = vmatprep.mubr.msk.f32.mxu0 %vm3816_vm2, %v3815_v0 }
 0x6dd   :  { %3097 = vmatprep.subr.mxu0 %v3815_v0  ;;  %3091 = vmatpush3.msra.mxu1 %v4306_v8 }
 0x6de   :  { %3098 = vmatpush3.msra.mxu0 %v4214_v61  ;;  %3130 = vmatprep.subr.mxu1 %v3815_v0 }
 0x6df   :  { %3099 = vmatprep.subr.mxu0 %v3815_v0 }
 0x6e0   :  { %3100 = vmatpush3.msra.mxu0 %v4219_v62 }
 0x6e1   :  { %3101 = vmatprep.subr.mxu0 %v3815_v0 }
 0x6e2   :  { %3102 = vmatpush3.msra.mxu0 %v4223_v63 }
 0x6e3   :  { %3103 = vmatprep.subr.mxu0 %v3815_v0 }
 0x6e4   :  { %3104 = vmatpush3.msra.mxu0 %v4227_v1 }
 0x6e5   :  { %3105 = vmatprep.subr.mxu0 %v3815_v0 }
 0x6e6   :  { %3106 = vmatpush3.msra.mxu0 %v4231_v2 }
 0x6e7   :  { %3107 = vmatprep.subr.mxu0 %v3815_v0 }
 0x6e8   :  { %3108 = vmatpush3.msra.mxu0 %v4257_v22 }
 0x6e9   :  { %3109 = vmatprep.subr.mxu0 %v3815_v0 }
 0x6ea   :  { %3110 = vmatpush3.msra.mxu0 %v4262_v24 }
 0x6eb   :  { %3111 = vmatprep.subr.mxu0 %v3815_v0 }
 0x6ec   :  { %3112 = vmatpush3.msra.mxu0 %v4268_v31 }
 0x6ed   :  { %3113 = vmatprep.subr.mxu0 %v3815_v0 }
 0x6ee   :  { %3114 = vmatpush3.msra.mxu0 %v4270_v32 }
 0x6ef   :  { %3115 = vmatprep.subr.mxu0 %v3815_v0 }
 0x6f0   :  { %3116 = vmatpush3.msra.mxu0 %v4276_v33 }
 0x6f1   :  { %3117 = vmatprep.subr.mxu0 %v3815_v0 }
 0x6f2   :  { %3118 = vmatpush3.msra.mxu0 %v4282_v4 }
 0x6f3   :  { %3119 = vmatprep.subr.mxu0 %v3815_v0 }
 0x6f4   :  { %3120 = vmatpush3.msra.mxu0 %v4288_v5 }
 0x6f5   :  { %3121 = vmatprep.subr.mxu0 %v3815_v0 }
 0x6f6   :  { %3122 = vmatpush3.msra.mxu0 %v4294_v6 }
 0x6f7   :  { %3123 = vmatprep.subr.mxu0 %v3815_v0 }
 0x6f8   :  { %3124 = vmatpush3.msra.mxu0 %v4300_v7 }
 0x6f9   :  { %3125 = vmatprep.subr.mxu0 %v3815_v0 }
 0x6fa   :  { %3126 = vmatpush3.msra.mxu0 %v4306_v8 }
 0x6fb   :  { %3165 = vmatprep.subr.mxu0 %v3815_v0 }
 0x79b   :  { %v3059_v10 = vpop.f32.mrf.mxu0 }
 0x79c   :  { %v4320_v11 = vadd.f32 %v3059_v10, %v2358_v9 }
 0x79d   :  { %v897_v12 = vpop.f32.mrf.mxu0 }
 0x79e   :  { %v4322_v13 = vadd.f32 %v2358_v9, %v897_v12  ;;  %3660 = vtanh.f32 %v4320_v11 }
 0x7a0   :  { %3662 = vtanh.f32 %v4322_v13 }
 0x7ab   :  { %v4326_v14 = vpop.eup %3660 }
 0x7ac   :  { %v910_v15 = vrot.slane %v4326_v14, 7 }
 0x7ad   :  { %v4329_v16 = vpop.eup %3662 }
 0x7ae   :  { %v911_v17 = vsel %vm183_vm3, %v910_v15, %v4329_v16 }
 0x7af   :  { %3093 = vmatmul.mubr.f32.vlgmr.msra.gmra.mxu1 %v911_v17 }
 0x7b0   :  { %3131 = vmatpush3.msra.mxu1 %v4212_v60  ;;  %3162 = vmatprep.mubr.msk.f32.mxu1 %vm3816_vm2, %v3815_v0 }
 0x7b1   :  { %3132 = vmatprep.subr.mxu1 %v3815_v0 }
 0x7b2   :  { %3133 = vmatpush3.msra.mxu1 %v4214_v61 }
 0x7b3   :  { %3134 = vmatprep.subr.mxu1 %v3815_v0 }
 0x7b4   :  { %3135 = vmatpush3.msra.mxu1 %v4219_v62 }
 0x7b5   :  { %3136 = vmatprep.subr.mxu1 %v3815_v0 }
 0x7b6   :  { %3137 = vmatpush3.msra.mxu1 %v4223_v63 }
 0x7b7   :  { %3138 = vmatprep.subr.mxu1 %v3815_v0 }
 0x7b8   :  { %3139 = vmatpush3.msra.mxu1 %v4227_v1 }
 0x7b9   :  { %3140 = vmatprep.subr.mxu1 %v3815_v0 }
 0x7ba   :  { %3141 = vmatpush3.msra.mxu1 %v4231_v2 }
 0x7bb   :  { %3142 = vmatprep.subr.mxu1 %v3815_v0 }
 0x7bc   :  { %3143 = vmatpush3.msra.mxu1 %v4257_v22 }
 0x7bd   :  { %3144 = vmatprep.subr.mxu1 %v3815_v0 }
 0x7be   :  { %3145 = vmatpush3.msra.mxu1 %v4262_v24 }
 0x7bf   :  { %3146 = vmatprep.subr.mxu1 %v3815_v0 }
 0x7c0   :  { %3147 = vmatpush3.msra.mxu1 %v4268_v31 }
 0x7c1   :  { %3148 = vmatprep.subr.mxu1 %v3815_v0 }
 0x7c2   :  { %3149 = vmatpush3.msra.mxu1 %v4270_v32 }
 0x7c3   :  { %3150 = vmatprep.subr.mxu1 %v3815_v0 }
 0x7c4   :  { %3151 = vmatpush3.msra.mxu1 %v4276_v33 }
 0x7c5   :  { %3152 = vmatprep.subr.mxu1 %v3815_v0 }
 0x7c6   :  { %3153 = vmatpush3.msra.mxu1 %v4282_v4 }
 0x7c7   :  { %3154 = vmatprep.subr.mxu1 %v3815_v0 }
 0x7c8   :  { %3155 = vmatpush3.msra.mxu1 %v4288_v5 }
 0x7c9   :  { %3156 = vmatprep.subr.mxu1 %v3815_v0 }
 0x7ca   :  { %3157 = vmatpush3.msra.mxu1 %v4294_v6 }
 0x7cb   :  { %3158 = vmatprep.subr.mxu1 %v3815_v0 }
 0x7cc   :  { %3159 = vmatpush3.msra.mxu1 %v4300_v7 }
 0x7cd   :  { %3160 = vmatprep.subr.mxu1 %v3815_v0 }
 0x7ce   :  { %3161 = vmatpush3.msra.mxu1 %v4306_v8 }
 0x7cf   :  { %3200 = vmatprep.subr.mxu1 %v3815_v0 }
 0x86f   :  { %v979_v18 = vpop.f32.mrf.mxu1 }
 0x870   :  { %v984_v19 = vrot.slane %v979_v18, 7  ;;  %v988_v36 = vadd.f32 %v979_v18, %v4320_v11 }
 0x871   :  { %v3094_v34 = vpop.f32.mrf.mxu1 }
 0x872   :  { %v987_v35 = vadd.f32 %v984_v19, %v4322_v13 }
 0x874   :  { %3664 = vtanh.f32 %v987_v35 }
 0x875   :  { %3666 = vtanh.f32 %v988_v36 }
 0x881   :  { %v3665_v37 = vpop.eup %3664 }
 0x882   :  { %v993_v38 = vrot.slane %v3665_v37, 1  ;;  %v3667_v39 = vpop.eup %3666  ;;  %v1500_v48 = vsel %vm773_vm4, %v4329_v16, %v3665_v37  ;;  %v1527_v37 = vld [vmem:[#allocation2 + $0xe0] sm:$0xff] }
 0x883   :  { %v1501_v52 = vsel %vm773_vm4, %v4326_v14, %v3667_v39 }
 0x884   :  { %v994_v40 = vsel %vm183_vm3, %v3667_v39, %v993_v38  ;;  %v1526_v38 = vld [vmem:[#allocation2 + $0xd8] sm:$0xff]  ;;  %v1525_v39 = vld [vmem:[#allocation2 + $0xd0] sm:$0xff] }
 0x885   :  { %3128 = vmatmul.mubr.f32.vlgmr.msra.gmra.mxu0 %v994_v40 }
 0x886   :  { %3166 = vmatpush3.msra.mxu0 %v4212_v60  ;;  %3197 = vmatprep.mubr.msk.f32.mxu0 %vm3816_vm2, %v3815_v0 }
 0x887   :  { %3167 = vmatprep.subr.mxu0 %v3815_v0 }
 0x888   :  { %3168 = vmatpush3.msra.mxu0 %v4214_v61 }
 0x889   :  { %3169 = vmatprep.subr.mxu0 %v3815_v0 }
 0x88a   :  { %3170 = vmatpush3.msra.mxu0 %v4219_v62 }
 0x88b   :  { %3171 = vmatprep.subr.mxu0 %v3815_v0 }
 0x88c   :  { %3172 = vmatpush3.msra.mxu0 %v4223_v63 }
 0x88d   :  { %3173 = vmatprep.subr.mxu0 %v3815_v0 }
 0x88e   :  { %3174 = vmatpush3.msra.mxu0 %v4227_v1 }
 0x88f   :  { %3175 = vmatprep.subr.mxu0 %v3815_v0 }
 0x890   :  { %3176 = vmatpush3.msra.mxu0 %v4231_v2 }
 0x891   :  { %3177 = vmatprep.subr.mxu0 %v3815_v0 }
 0x892   :  { %3178 = vmatpush3.msra.mxu0 %v4257_v22 }
 0x893   :  { %3179 = vmatprep.subr.mxu0 %v3815_v0 }
 0x894   :  { %3180 = vmatpush3.msra.mxu0 %v4262_v24 }
 0x895   :  { %3181 = vmatprep.subr.mxu0 %v3815_v0 }
 0x896   :  { %3182 = vmatpush3.msra.mxu0 %v4268_v31 }
 0x897   :  { %3183 = vmatprep.subr.mxu0 %v3815_v0 }
 0x898   :  { %3184 = vmatpush3.msra.mxu0 %v4270_v32 }
 0x899   :  { %3185 = vmatprep.subr.mxu0 %v3815_v0 }
 0x89a   :  { %3186 = vmatpush3.msra.mxu0 %v4276_v33 }
 0x89b   :  { %3187 = vmatprep.subr.mxu0 %v3815_v0 }
 0x89c   :  { %3188 = vmatpush3.msra.mxu0 %v4282_v4 }
 0x89d   :  { %3189 = vmatprep.subr.mxu0 %v3815_v0 }
 0x89e   :  { %3190 = vmatpush3.msra.mxu0 %v4288_v5 }
 0x89f   :  { %3191 = vmatprep.subr.mxu0 %v3815_v0 }
 0x8a0   :  { %3192 = vmatpush3.msra.mxu0 %v4294_v6 }
 0x8a1   :  { %3193 = vmatprep.subr.mxu0 %v3815_v0 }
 0x8a2   :  { %3194 = vmatpush3.msra.mxu0 %v4300_v7 }
 0x8a3   :  { %3195 = vmatprep.subr.mxu0 %v3815_v0 }
 0x8a4   :  { %3196 = vmatpush3.msra.mxu0 %v4306_v8 }
 0x8a5   :  { %3235 = vmatprep.subr.mxu0 %v3815_v0 }
 0x945   :  { %v1062_v41 = vpop.f32.mrf.mxu0 }
 0x946   :  { %v1067_v42 = vrot.slane %v1062_v41, 6  ;;  %v1068_v43 = vrot.slane %v1062_v41, 7 }
 0x947   :  { %v3129_v44 = vpop.f32.mrf.mxu0 }
 0x948   :  { %v1071_v45 = vadd.f32 %v1067_v42, %v4322_v13  ;;  %v1072_v46 = vadd.f32 %v1068_v43, %v4320_v11 }
 0x94a   :  { %3668 = vtanh.f32 %v1071_v45 }
 0x94b   :  { %3670 = vtanh.f32 %v1072_v46 }
 0x957   :  { %v3669_v47 = vpop.eup %3668 }
 0x958   :  { %v3671_v49 = vpop.eup %3670  ;;  %v1077_v50 = vrot.slane %v3669_v47, 2  ;;  %v1502_v51 = vsel %vm776_vm5, %v1500_v48, %v3669_v47 }
 0x959   :  { %v1078_v53 = vrot.slane %v3671_v49, 1  ;;  %v1503_v54 = vsel %vm776_vm5, %v1501_v52, %v3671_v49 }
 0x95b   :  { %v1079_v55 = vsel %vm183_vm3, %v1078_v53, %v1077_v50  ;;  %v1524_v53 = vld [vmem:[#allocation2 + $0xc8] sm:$0xff] }
 0x95c   :  { %3163 = vmatmul.mubr.f32.vlgmr.msra.gmra.mxu1 %v1079_v55  ;;  %v1522_v55 = vld [vmem:[#allocation2 + $0xb8] sm:$0xff] }
 0x95d   :  { %3201 = vmatpush3.msra.mxu1 %v4212_v60  ;;  %3232 = vmatprep.mubr.msk.f32.mxu1 %vm3816_vm2, %v3815_v0 }
 0x95e   :  { %3202 = vmatprep.subr.mxu1 %v3815_v0 }
 0x95f   :  { %3203 = vmatpush3.msra.mxu1 %v4214_v61 }
 0x960   :  { %3204 = vmatprep.subr.mxu1 %v3815_v0 }
 0x961   :  { %3205 = vmatpush3.msra.mxu1 %v4219_v62 }
 0x962   :  { %3206 = vmatprep.subr.mxu1 %v3815_v0 }
 0x963   :  { %3207 = vmatpush3.msra.mxu1 %v4223_v63 }
 0x964   :  { %3208 = vmatprep.subr.mxu1 %v3815_v0 }
 0x965   :  { %3209 = vmatpush3.msra.mxu1 %v4227_v1 }
 0x966   :  { %3210 = vmatprep.subr.mxu1 %v3815_v0 }
 0x967   :  { %3211 = vmatpush3.msra.mxu1 %v4231_v2 }
 0x968   :  { %3212 = vmatprep.subr.mxu1 %v3815_v0 }
 0x969   :  { %3213 = vmatpush3.msra.mxu1 %v4257_v22 }
 0x96a   :  { %3214 = vmatprep.subr.mxu1 %v3815_v0 }
 0x96b   :  { %3215 = vmatpush3.msra.mxu1 %v4262_v24 }
 0x96c   :  { %3216 = vmatprep.subr.mxu1 %v3815_v0 }
 0x96d   :  { %3217 = vmatpush3.msra.mxu1 %v4268_v31 }
 0x96e   :  { %3218 = vmatprep.subr.mxu1 %v3815_v0 }
 0x96f   :  { %3219 = vmatpush3.msra.mxu1 %v4270_v32 }
 0x970   :  { %3220 = vmatprep.subr.mxu1 %v3815_v0 }
 0x971   :  { %3221 = vmatpush3.msra.mxu1 %v4276_v33 }
 0x972   :  { %3222 = vmatprep.subr.mxu1 %v3815_v0 }
 0x973   :  { %3223 = vmatpush3.msra.mxu1 %v4282_v4 }
 0x974   :  { %3224 = vmatprep.subr.mxu1 %v3815_v0 }
 0x975   :  { %3225 = vmatpush3.msra.mxu1 %v4288_v5 }
 0x976   :  { %3226 = vmatprep.subr.mxu1 %v3815_v0 }
 0x977   :  { %3227 = vmatpush3.msra.mxu1 %v4294_v6 }
 0x978   :  { %3228 = vmatprep.subr.mxu1 %v3815_v0 }
 0x979   :  { %3229 = vmatpush3.msra.mxu1 %v4300_v7 }
 0x97a   :  { %3230 = vmatprep.subr.mxu1 %v3815_v0 }
 0x97b   :  { %3231 = vmatpush3.msra.mxu1 %v4306_v8 }
 0x97c   :  { %3270 = vmatprep.subr.mxu1 %v3815_v0 }
 0xa1c   :  { %v1147_v56 = vpop.f32.mrf.mxu1 }
 0xa1d   :  { %v1152_v57 = vrot.slane %v1147_v56, 5  ;;  %v1153_v58 = vrot.slane %v1147_v56, 6  ;;  %v1521_v56 = vld [vmem:[#allocation2 + $0xb0] sm:$0xff] }
 0xa1e   :  { %v3164_v59 = vpop.f32.mrf.mxu1 }
 0xa1f   :  { %v1156_v3 = vadd.f32 %v1152_v57, %v4322_v13  ;;  %v1157_v20 = vadd.f32 %v1153_v58, %v4320_v11  ;;  %v1520_v57 = vld [vmem:[#allocation2 + $0xa8] sm:$0xff]  ;;  %v1519_v58 = vld [vmem:[#allocation2 + $0xa0] sm:$0xff]  ;;  %v1518_v59 = vld [vmem:[#allocation2 + $0x98] sm:$0xff] }
 0xa21   :  { %3672 = vtanh.f32 %v1156_v3  ;;  %v1517_v3 = vld [vmem:[#allocation2 + $0x90] sm:$0xff] }
 0xa22   :  { %3674 = vtanh.f32 %v1157_v20  ;;  %v1516_v20 = vld [vmem:[#allocation2 + $0x88] sm:$0xff] }
 0xa2e   :  { %v3673_v21 = vpop.eup %3672 }
 0xa2f   :  { %v3675_v23 = vpop.eup %3674  ;;  %v1162_v25 = vrot.slane %v3673_v21, 3  ;;  %v1504_v26 = vsel %vm779_vm6, %v1502_v51, %v3673_v21  ;;  %v1515_v21 = vld [vmem:[#allocation2 + $0x80] sm:$0xff] }
 0xa30   :  { %v1163_v27 = vrot.slane %v3675_v23, 2  ;;  %v1505_v28 = vsel %vm779_vm6, %v1503_v54, %v3675_v23  ;;  %v1523_v54 = vld [vmem:[#allocation2 + $0xc0] sm:$0xff]  ;;  %v4540_v23 = vld [vmem:[#allocation5 + $0x178] sm:$0xff] }
 0xa32   :  { %v1164_v29 = vsel %vm183_vm3, %v1163_v27, %v1162_v25  ;;  %v4542_v25 = vld [vmem:[#allocation5 + $0x170] sm:$0xff]  ;;  %v4551_v27 = vld [vmem:[#allocation5 + $0x160] sm:$0xff] }
 0xa33   :  { %3198 = vmatmul.mubr.f32.vlgmr.msra.gmra.mxu0 %v1164_v29  ;;  %v4559_v29 = vld [vmem:[#allocation5 + $0x150] sm:$0xff] }
 0xa34   :  { %3236 = vmatpush3.msra.mxu0 %v4212_v60  ;;  %3267 = vmatprep.mubr.msk.f32.mxu0 %vm3816_vm2, %v3815_v0 }
 0xa35   :  { %3237 = vmatprep.subr.mxu0 %v3815_v0 }
 0xa36   :  { %3238 = vmatpush3.msra.mxu0 %v4214_v61 }
 0xa37   :  { %3239 = vmatprep.subr.mxu0 %v3815_v0 }
 0xa38   :  { %3240 = vmatpush3.msra.mxu0 %v4219_v62 }
 0xa39   :  { %3241 = vmatprep.subr.mxu0 %v3815_v0 }
 0xa3a   :  { %3242 = vmatpush3.msra.mxu0 %v4223_v63 }
 0xa3b   :  { %3243 = vmatprep.subr.mxu0 %v3815_v0 }
 0xa3c   :  { %3244 = vmatpush3.msra.mxu0 %v4227_v1 }
 0xa3d   :  { %3245 = vmatprep.subr.mxu0 %v3815_v0 }
 0xa3e   :  { %3246 = vmatpush3.msra.mxu0 %v4231_v2 }
 0xa3f   :  { %3247 = vmatprep.subr.mxu0 %v3815_v0 }
 0xa40   :  { %3248 = vmatpush3.msra.mxu0 %v4257_v22 }
 0xa41   :  { %3249 = vmatprep.subr.mxu0 %v3815_v0 }
 0xa42   :  { %3250 = vmatpush3.msra.mxu0 %v4262_v24 }
 0xa43   :  { %3251 = vmatprep.subr.mxu0 %v3815_v0 }
 0xa44   :  { %3252 = vmatpush3.msra.mxu0 %v4268_v31 }
 0xa45   :  { %3253 = vmatprep.subr.mxu0 %v3815_v0 }
 0xa46   :  { %3254 = vmatpush3.msra.mxu0 %v4270_v32 }
 0xa47   :  { %3255 = vmatprep.subr.mxu0 %v3815_v0 }
 0xa48   :  { %3256 = vmatpush3.msra.mxu0 %v4276_v33 }
 0xa49   :  { %3257 = vmatprep.subr.mxu0 %v3815_v0 }
 0xa4a   :  { %3258 = vmatpush3.msra.mxu0 %v4282_v4 }
 0xa4b   :  { %3259 = vmatprep.subr.mxu0 %v3815_v0 }
 0xa4c   :  { %3260 = vmatpush3.msra.mxu0 %v4288_v5 }
 0xa4d   :  { %3261 = vmatprep.subr.mxu0 %v3815_v0 }
 0xa4e   :  { %3262 = vmatpush3.msra.mxu0 %v4294_v6 }
 0xa4f   :  { %3263 = vmatprep.subr.mxu0 %v3815_v0 }
 0xa50   :  { %3264 = vmatpush3.msra.mxu0 %v4300_v7 }
 0xa51   :  { %3265 = vmatprep.subr.mxu0 %v3815_v0 }
 0xa52   :  { %3266 = vmatpush3.msra.mxu0 %v4306_v8 }
 0xaf3   :  { %v1232_v30 = vpop.f32.mrf.mxu0 }
 0xaf4   :  { %v1237_v9 = vrot.slane %v1232_v30, 4  ;;  %v1238_v10 = vrot.slane %v1232_v30, 5 }
 0xaf5   :  { %v3199_v12 = vpop.f32.mrf.mxu0 }
 0xaf6   :  { %v1241_v14 = vadd.f32 %v1237_v9, %v4322_v13  ;;  %v1242_v15 = vadd.f32 %v1238_v10, %v4320_v11 }
 0xaf8   :  { %3676 = vtanh.f32 %v1241_v14 }
 0xaf9   :  { %3678 = vtanh.f32 %v1242_v15 }
 0xb05   :  { %v3677_v16 = vpop.eup %3676 }
 0xb06   :  { %v3679_v17 = vpop.eup %3678  ;;  %v1247_v18 = vrot.slane %v3677_v16, 4  ;;  %v1506_v19 = vsel %vm782_vm7, %v1504_v26, %v3677_v16  ;;  %v4547_v26 = vld [vmem:[#allocation5 + $0x168] sm:$0xff] }
 0xb07   :  { %v1248_v34 = vrot.slane %v3679_v17, 3  ;;  %v1507_v35 = vsel %vm782_vm7, %v1505_v28, %v3679_v17  ;;  %v4555_v28 = vld [vmem:[#allocation5 + $0x158] sm:$0xff] }
 0xb09   :  { %v1249_v36 = vsel %vm183_vm3, %v1248_v34, %v1247_v18  ;;  %v4596_v34 = vld [vmem:[#allocation5 + $0x138] sm:$0xff] }
 0xb0a   :  { %3233 = vmatmul.mubr.f32.vlgmr.msra.gmra.mxu1 %v1249_v36  ;;  %v4604_v36 = vld [vmem:[#allocation5 + $0x128] sm:$0xff] }
 0xb0b   :  { %3271 = vmatpush3.msra.mxu1 %v4212_v60  ;;  %3302 = vmatprep.mubr.msk.f32.mxu1 %vm3816_vm2, %v3815_v0 }
 0xb0c   :  { %3272 = vmatprep.subr.mxu1 %v3815_v0 }
 0xb0d   :  { %3273 = vmatpush3.msra.mxu1 %v4214_v61 }
 0xb0e   :  { %3274 = vmatprep.subr.mxu1 %v3815_v0 }
 0xb0f   :  { %3275 = vmatpush3.msra.mxu1 %v4219_v62 }
 0xb10   :  { %3276 = vmatprep.subr.mxu1 %v3815_v0 }
 0xb11   :  { %3277 = vmatpush3.msra.mxu1 %v4223_v63 }
 0xb12   :  { %3278 = vmatprep.subr.mxu1 %v3815_v0 }
 0xb13   :  { %3279 = vmatpush3.msra.mxu1 %v4227_v1 }
 0xb14   :  { %3280 = vmatprep.subr.mxu1 %v3815_v0 }
 0xb15   :  { %3281 = vmatpush3.msra.mxu1 %v4231_v2 }
 0xb16   :  { %3282 = vmatprep.subr.mxu1 %v3815_v0 }
 0xb17   :  { %3283 = vmatpush3.msra.mxu1 %v4257_v22 }
 0xb18   :  { %3284 = vmatprep.subr.mxu1 %v3815_v0 }
 0xb19   :  { %3285 = vmatpush3.msra.mxu1 %v4262_v24 }
 0xb1a   :  { %3286 = vmatprep.subr.mxu1 %v3815_v0 }
 0xb1b   :  { %3287 = vmatpush3.msra.mxu1 %v4268_v31 }
 0xb1c   :  { %3288 = vmatprep.subr.mxu1 %v3815_v0 }
 0xb1d   :  { %3289 = vmatpush3.msra.mxu1 %v4270_v32 }
 0xb1e   :  { %3290 = vmatprep.subr.mxu1 %v3815_v0 }
 0xb1f   :  { %3291 = vmatpush3.msra.mxu1 %v4276_v33 }
 0xb20   :  { %3292 = vmatprep.subr.mxu1 %v3815_v0 }
 0xb21   :  { %3293 = vmatpush3.msra.mxu1 %v4282_v4 }
 0xb22   :  { %3294 = vmatprep.subr.mxu1 %v3815_v0 }
 0xb23   :  { %3295 = vmatpush3.msra.mxu1 %v4288_v5 }
 0xb24   :  { %3296 = vmatprep.subr.mxu1 %v3815_v0 }
 0xb25   :  { %3297 = vmatpush3.msra.mxu1 %v4294_v6  ;;  %v1530_v6 = vld [vmem:[#allocation2 + $0xf8] sm:$0xff] }
 0xb26   :  { %3298 = vmatprep.subr.mxu1 %v3815_v0  ;;  %3305 = vmatprep.subr.mxu0 %v1530_v6 }
 0xb27   :  { %3299 = vmatpush3.msra.mxu1 %v4300_v7  ;;  %v1529_v7 = vld [vmem:[#allocation2 + $0xf0] sm:$0xff] }
 0xb28   :  { %3300 = vmatprep.subr.mxu1 %v3815_v0 }
 0xb29   :  { %3301 = vmatpush3.msra.mxu1 %v4306_v8  ;;  %v1528_v8 = vld [vmem:[#allocation2 + $0xe8] sm:$0xff] }
 0xb2a   :  { %3340 = vmatprep.subr.mxu1 %v3815_v0 }
 0xbca   :  { %v1317_v60 = vpop.f32.mrf.mxu1 }
 0xbcb   :  { %v1322_v61 = vrot.slane %v1317_v60, 3  ;;  %v1323_v62 = vrot.slane %v1317_v60, 4  ;;  %v4610_v60 = vld [vmem:[#allocation5 + $0x120] sm:$0xff] }
 0xbcc   :  { %v3234_v63 = vpop.f32.mrf.mxu1 }
 0xbcd   :  { %v1326_v1 = vadd.f32 %v1322_v61, %v4322_v13  ;;  %v1327_v2 = vadd.f32 %v1323_v62, %v4320_v11  ;;  %v4616_v61 = vld [vmem:[#allocation5 + $0x118] sm:$0xff]  ;;  %v4622_v62 = vld [vmem:[#allocation5 + $0x110] sm:$0xff]  ;;  %v4628_v63 = vld [vmem:[#allocation5 + $0x108] sm:$0xff] }
 0xbcf   :  { %3680 = vtanh.f32 %v1326_v1  ;;  %v4634_v1 = vld [vmem:[#allocation5 + $0x100] sm:$0xff] }
 0xbd0   :  { %3682 = vtanh.f32 %v1327_v2  ;;  %v2359_v2 = vld [vmem:[%s4878_s4 + $0x2] ss:$0 sm:$0xff] }
 0xbdc   :  { %v3681_v22 = vpop.eup %3680 }
 0xbdd   :  { %v3683_v24 = vpop.eup %3682  ;;  %v1332_v31 = vrot.slane %v3681_v22, 5  ;;  %v1508_v32 = vsel %vm785_vm8, %v1506_v19, %v3681_v22 }
 0xbde   :  { %v1333_v33 = vrot.slane %v3683_v24, 4  ;;  %v1509_v4 = vsel %vm785_vm8, %v1507_v35, %v3683_v24  ;;  %v4598_v35 = vld [vmem:[#allocation5 + $0x130] sm:$0xff] }
 0xbe0   :  { %v1334_v5 = vsel %vm183_vm3, %v1333_v33, %v1332_v31 }
 0xbe1   :  { %3268 = vmatmul.mubr.f32.vlgmr.msra.gmra.mxu0 %v1334_v5 }
 0xbe2   :  { %3306 = vmatpush3.msra.mxu0 %v1530_v6 }
 0xbe3   :  { %3307 = vmatprep.subr.mxu0 %v1529_v7 }
 0xbe4   :  { %3308 = vmatpush3.msra.mxu0 %v1529_v7 }
 0xbe5   :  { %3309 = vmatprep.subr.mxu0 %v1528_v8 }
 0xbe6   :  { %3310 = vmatpush3.msra.mxu0 %v1528_v8 }
 0xbe7   :  { %3311 = vmatprep.subr.mxu0 %v1527_v37 }
 0xbe8   :  { %3312 = vmatpush3.msra.mxu0 %v1527_v37 }
 0xbe9   :  { %3313 = vmatprep.subr.mxu0 %v1526_v38 }
 0xbea   :  { %3314 = vmatpush3.msra.mxu0 %v1526_v38 }
 0xbeb   :  { %3315 = vmatprep.subr.mxu0 %v1525_v39 }
 0xbec   :  { %3316 = vmatpush3.msra.mxu0 %v1525_v39 }
 0xbed   :  { %3317 = vmatprep.subr.mxu0 %v1524_v53 }
 0xbee   :  { %3318 = vmatpush3.msra.mxu0 %v1524_v53 }
 0xbef   :  { %3319 = vmatprep.subr.mxu0 %v1523_v54 }
 0xbf0   :  { %3320 = vmatpush3.msra.mxu0 %v1523_v54 }
 0xbf1   :  { %3321 = vmatprep.subr.mxu0 %v1522_v55 }
 0xbf2   :  { %3322 = vmatpush3.msra.mxu0 %v1522_v55 }
 0xbf3   :  { %3323 = vmatprep.subr.mxu0 %v1521_v56 }
 0xbf4   :  { %3324 = vmatpush3.msra.mxu0 %v1521_v56 }
 0xbf5   :  { %3325 = vmatprep.subr.mxu0 %v1520_v57 }
 0xbf6   :  { %3326 = vmatpush3.msra.mxu0 %v1520_v57 }
 0xbf7   :  { %3327 = vmatprep.subr.mxu0 %v1519_v58 }
 0xbf8   :  { %3328 = vmatpush3.msra.mxu0 %v1519_v58 }
 0xbf9   :  { %3329 = vmatprep.subr.mxu0 %v1518_v59 }
 0xbfa   :  { %3330 = vmatpush3.msra.mxu0 %v1518_v59 }
 0xbfb   :  { %3331 = vmatprep.subr.mxu0 %v1517_v3 }
 0xbfc   :  { %3332 = vmatpush3.msra.mxu0 %v1517_v3 }
 0xbfd   :  { %3333 = vmatprep.subr.mxu0 %v1516_v20 }
 0xbfe   :  { %3334 = vmatpush3.msra.mxu0 %v1516_v20 }
 0xbff   :  { %3335 = vmatprep.subr.mxu0 %v1515_v21 }
 0xc00   :  { %3336 = vmatpush3.msra.mxu0 %v1515_v21 }
 0xc01   :  { %3375 = vmatprep.subr.mxu0 %v3815_v0 }
 0xca1   :  { %v1402_v40 = vpop.f32.mrf.mxu0 }
 0xca2   :  { %v1407_v41 = vrot.slane %v1402_v40, 2  ;;  %v1408_v42 = vrot.slane %v1402_v40, 3 }
 0xca3   :  { %v3269_v43 = vpop.f32.mrf.mxu0 }
 0xca4   :  { %v1411_v44 = vadd.f32 %v1407_v41, %v4322_v13  ;;  %v1412_v45 = vadd.f32 %v1408_v42, %v4320_v11 }
 0xca6   :  { %3684 = vtanh.f32 %v1411_v44 }
 0xca7   :  { %3686 = vtanh.f32 %v1412_v45 }
 0xcb3   :  { %v3685_v46 = vpop.eup %3684 }
 0xcb4   :  { %v3687_v47 = vpop.eup %3686  ;;  %v1417_v48 = vrot.slane %v3685_v46, 6  ;;  %v4532_v49 = vsel %vm99_vm0, %v1508_v32, %v3685_v46 }
 0xcb5   :  { %v1418_v50 = vrot.slane %v3687_v47, 5  ;;  %v4535_v51 = vsel %vm99_vm0, %v1509_v4, %v3687_v47 }
 0xcb7   :  { %v1419_v52 = vsel %vm183_vm3, %v1418_v50, %v1417_v48 }
 0xcb8   :  { %3303 = vmatmul.mubr.f32.vlgmr.msra.gmra.mxu1 %v1419_v52 }
 0xcb9   :  { %3372 = vmatprep.mubr.msk.f32.mxu1 %vm3816_vm2, %v3815_v0  ;;  %3341 = vmatpush3.msra.mxu1 %v4540_v23 }
 0xcba   :  { %3342 = vmatprep.subr.mxu1 %v3815_v0 }
 0xcbb   :  { %3343 = vmatpush3.msra.mxu1 %v4542_v25 }
 0xcbc   :  { %3344 = vmatprep.subr.mxu1 %v3815_v0 }
 0xcbd   :  { %3345 = vmatpush3.msra.mxu1 %v4547_v26 }
 0xcbe   :  { %3346 = vmatprep.subr.mxu1 %v3815_v0 }
 0xcbf   :  { %3347 = vmatpush3.msra.mxu1 %v4551_v27 }
 0xcc0   :  { %3348 = vmatprep.subr.mxu1 %v3815_v0 }
 0xcc1   :  { %3349 = vmatpush3.msra.mxu1 %v4555_v28 }
 0xcc2   :  { %3350 = vmatprep.subr.mxu1 %v3815_v0 }
 0xcc3   :  { %3351 = vmatpush3.msra.mxu1 %v4559_v29 }
 0xcc4   :  { %3352 = vmatprep.subr.mxu1 %v3815_v0 }
 0xd78   :  { %v1487_v30 = vpop.f32.mrf.mxu1 }
 0xd79   :  { %v1492_v9 = vrot.slane %v1487_v30, 1  ;;  %v1493_v10 = vrot.slane %v1487_v30, 2 }
 0xd7a   :  { %v3304_v12 = vpop.f32.mrf.mxu1 }
 0xd7b   :  { %v1496_v14 = vadd.f32 %v1492_v9, %v4322_v13  ;;  %v1497_v15 = vadd.f32 %v1493_v10, %v4320_v11  ;;  %v4585_v11 = vld [vmem:[#allocation5 + $0x148] sm:$0xff]  ;;  %v4590_v13 = vld [vmem:[#allocation5 + $0x140] sm:$0xff] }
 0xd7c   :  { %3353 = vmatpush3.msra.mxu1 %v4585_v11 }
 0xd7d   :  { %3688 = vtanh.f32 %v1496_v14  ;;  %3354 = vmatprep.subr.mxu1 %v3815_v0 }
 0xd7e   :  { %3690 = vtanh.f32 %v1497_v15  ;;  %3355 = vmatpush3.msra.mxu1 %v4590_v13 }
 0xd7f   :  { %3356 = vmatprep.subr.mxu1 %v3815_v0 }
 0xd80   :  { %3357 = vmatpush3.msra.mxu1 %v4596_v34 }
 0xd81   :  { %3358 = vmatprep.subr.mxu1 %v3815_v0 }
 0xd82   :  { %3359 = vmatpush3.msra.mxu1 %v4598_v35 }
 0xd83   :  { %3360 = vmatprep.subr.mxu1 %v3815_v0 }
 0xd84   :  { %3361 = vmatpush3.msra.mxu1 %v4604_v36 }
 0xd85   :  { %3362 = vmatprep.subr.mxu1 %v3815_v0 }
 0xd86   :  { %3363 = vmatpush3.msra.mxu1 %v4610_v60 }
 0xd87   :  { %3364 = vmatprep.subr.mxu1 %v3815_v0 }
 0xd88   :  { %3365 = vmatpush3.msra.mxu1 %v4616_v61 }
 0xd89   :  { %3366 = vmatprep.subr.mxu1 %v3815_v0 }
 0xd8a   :  { %v3689_v16 = vpop.eup %3688  ;;  %3367 = vmatpush3.msra.mxu1 %v4622_v62 }
 0xd8b   :  { %v3691_v17 = vpop.eup %3690  ;;  %v1512_v18 = vsel %vm790_vm9, %v4532_v49, %v3689_v16  ;;  %3368 = vmatprep.subr.mxu1 %v3815_v0 }
 0xd8c   :  { %3337 = vmatprep.mubr.f32.mxu0 %v1512_v18  ;;  %v1513_v19 = vsel %vm790_vm9, %v4535_v51, %v3691_v17  ;;  %3369 = vmatpush3.msra.mxu1 %v4628_v63 }
 0xd8d   :  { %3338 = vmatmul.mubr.f32.vlgmr.msra.gmra.mxu0 %v1513_v19  ;;  %3370 = vmatprep.subr.mxu1 %v3815_v0 }
 0xd8e   :  { %3376 = vmatpush3.msra.mxu0 %v4540_v23  ;;  %3407 = vmatprep.mubr.msk.f32.mxu0 %vm3816_vm2, %v3815_v0 }
 0xd8f   :  { %3377 = vmatprep.subr.mxu0 %v3815_v0  ;;  %3371 = vmatpush3.msra.mxu1 %v4634_v1 }
 0xd90   :  { %3378 = vmatpush3.msra.mxu0 %v4542_v25  ;;  %3410 = vmatprep.subr.mxu1 %v3815_v0 }
 0xd91   :  { %3379 = vmatprep.subr.mxu0 %v3815_v0 }
 0xd92   :  { %3380 = vmatpush3.msra.mxu0 %v4547_v26 }
 0xd93   :  { %3381 = vmatprep.subr.mxu0 %v3815_v0 }
 0xd94   :  { %3382 = vmatpush3.msra.mxu0 %v4551_v27 }
 0xd95   :  { %3383 = vmatprep.subr.mxu0 %v3815_v0 }
 0xd96   :  { %3384 = vmatpush3.msra.mxu0 %v4555_v28 }
 0xd97   :  { %3385 = vmatprep.subr.mxu0 %v3815_v0 }
 0xd98   :  { %3386 = vmatpush3.msra.mxu0 %v4559_v29 }
 0xd99   :  { %3387 = vmatprep.subr.mxu0 %v3815_v0 }
 0xd9a   :  { %3388 = vmatpush3.msra.mxu0 %v4585_v11 }
 0xd9b   :  { %3389 = vmatprep.subr.mxu0 %v3815_v0 }
 0xd9c   :  { %3390 = vmatpush3.msra.mxu0 %v4590_v13 }
 0xd9d   :  { %3391 = vmatprep.subr.mxu0 %v3815_v0 }
 0xd9e   :  { %3392 = vmatpush3.msra.mxu0 %v4596_v34 }
 0xd9f   :  { %3393 = vmatprep.subr.mxu0 %v3815_v0 }
 0xda0   :  { %3394 = vmatpush3.msra.mxu0 %v4598_v35 }
 0xda1   :  { %3395 = vmatprep.subr.mxu0 %v3815_v0 }
 0xda2   :  { %3396 = vmatpush3.msra.mxu0 %v4604_v36 }
 0xda3   :  { %3397 = vmatprep.subr.mxu0 %v3815_v0 }
 0xda4   :  { %3398 = vmatpush3.msra.mxu0 %v4610_v60 }
 0xda5   :  { %3399 = vmatprep.subr.mxu0 %v3815_v0 }
 0xda6   :  { %3400 = vmatpush3.msra.mxu0 %v4616_v61 }
 0xda7   :  { %3401 = vmatprep.subr.mxu0 %v3815_v0 }
 0xda8   :  { %3402 = vmatpush3.msra.mxu0 %v4622_v62 }
 0xda9   :  { %3403 = vmatprep.subr.mxu0 %v3815_v0 }
 0xdaa   :  { %3404 = vmatpush3.msra.mxu0 %v4628_v63 }
 0xdab   :  { %3405 = vmatprep.subr.mxu0 %v3815_v0 }
 0xdac   :  { %3406 = vmatpush3.msra.mxu0 %v4634_v1 }
 0xdad   :  { %3445 = vmatprep.subr.mxu0 %v3815_v0 }
 0xe4d   :  { %v3339_v22 = vpop.f32.mrf.mxu0 }
 0xe4e   :  { %v4648_v24 = vadd.f32 %v3339_v22, %v2359_v2 }
 0xe4f   :  { %v1619_v31 = vpop.f32.mrf.mxu0 }
 0xe50   :  { %v4650_v32 = vadd.f32 %v2359_v2, %v1619_v31  ;;  %3692 = vtanh.f32 %v4648_v24 }
 0xe52   :  { %3694 = vtanh.f32 %v4650_v32 }
 0xe5d   :  { %v4654_v33 = vpop.eup %3692 }
 0xe5e   :  { %v1632_v4 = vrot.slane %v4654_v33, 7 }
 0xe5f   :  { %v4657_v5 = vpop.eup %3694 }
 0xe60   :  { %v1633_v6 = vsel %vm183_vm3, %v1632_v4, %v4657_v5 }
 0xe61   :  { %3373 = vmatmul.mubr.f32.vlgmr.msra.gmra.mxu1 %v1633_v6 }
 0xe62   :  { %3411 = vmatpush3.msra.mxu1 %v4540_v23  ;;  %3442 = vmatprep.mubr.msk.f32.mxu1 %vm3816_vm2, %v3815_v0 }
 0xe63   :  { %3412 = vmatprep.subr.mxu1 %v3815_v0 }
 0xe64   :  { %3413 = vmatpush3.msra.mxu1 %v4542_v25 }
 0xe65   :  { %3414 = vmatprep.subr.mxu1 %v3815_v0 }
 0xe66   :  { %3415 = vmatpush3.msra.mxu1 %v4547_v26 }
 0xe67   :  { %3416 = vmatprep.subr.mxu1 %v3815_v0 }
 0xe68   :  { %3417 = vmatpush3.msra.mxu1 %v4551_v27 }
 0xe69   :  { %3418 = vmatprep.subr.mxu1 %v3815_v0 }
 0xe6a   :  { %3419 = vmatpush3.msra.mxu1 %v4555_v28 }
 0xe6b   :  { %3420 = vmatprep.subr.mxu1 %v3815_v0 }
 0xe6c   :  { %3421 = vmatpush3.msra.mxu1 %v4559_v29 }
 0xe6d   :  { %3422 = vmatprep.subr.mxu1 %v3815_v0 }
 0xe6e   :  { %3423 = vmatpush3.msra.mxu1 %v4585_v11 }
 0xe6f   :  { %3424 = vmatprep.subr.mxu1 %v3815_v0 }
 0xe70   :  { %3425 = vmatpush3.msra.mxu1 %v4590_v13 }
 0xe71   :  { %3426 = vmatprep.subr.mxu1 %v3815_v0 }
 0xe72   :  { %3427 = vmatpush3.msra.mxu1 %v4596_v34 }
 0xe73   :  { %3428 = vmatprep.subr.mxu1 %v3815_v0 }
 0xe74   :  { %3429 = vmatpush3.msra.mxu1 %v4598_v35 }
 0xe75   :  { %3430 = vmatprep.subr.mxu1 %v3815_v0 }
 0xe76   :  { %3431 = vmatpush3.msra.mxu1 %v4604_v36 }
 0xe77   :  { %3432 = vmatprep.subr.mxu1 %v3815_v0 }
 0xe78   :  { %3433 = vmatpush3.msra.mxu1 %v4610_v60 }
 0xe79   :  { %3434 = vmatprep.subr.mxu1 %v3815_v0 }
 0xe7a   :  { %3435 = vmatpush3.msra.mxu1 %v4616_v61 }
 0xe7b   :  { %3436 = vmatprep.subr.mxu1 %v3815_v0 }
 0xe7c   :  { %3437 = vmatpush3.msra.mxu1 %v4622_v62 }
 0xe7d   :  { %3438 = vmatprep.subr.mxu1 %v3815_v0 }
 0xe7e   :  { %3439 = vmatpush3.msra.mxu1 %v4628_v63 }
 0xe7f   :  { %3440 = vmatprep.subr.mxu1 %v3815_v0 }
 0xe80   :  { %3441 = vmatpush3.msra.mxu1 %v4634_v1 }
 0xe81   :  { %3480 = vmatprep.subr.mxu1 %v3815_v0 }
 0xf21   :  { %v1701_v7 = vpop.f32.mrf.mxu1 }
 0xf22   :  { %v1706_v8 = vrot.slane %v1701_v7, 7  ;;  %v1710_v39 = vadd.f32 %v1701_v7, %v4648_v24 }
 0xf23   :  { %v3374_v37 = vpop.f32.mrf.mxu1 }
 0xf24   :  { %v1709_v38 = vadd.f32 %v1706_v8, %v4650_v32 }
 0xf26   :  { %3696 = vtanh.f32 %v1709_v38 }
 0xf27   :  { %3698 = vtanh.f32 %v1710_v39 }
 0xf33   :  { %v3697_v40 = vpop.eup %3696 }
 0xf34   :  { %v1715_v41 = vrot.slane %v3697_v40, 1  ;;  %v3699_v42 = vpop.eup %3698  ;;  %v2222_v51 = vsel %vm773_vm4, %v4657_v5, %v3697_v40  ;;  %v2247_v40 = vld [vmem:[#allocation7 + $0x58] sm:$0xff] }
 0xf35   :  { %v2223_v55 = vsel %vm773_vm4, %v4654_v33, %v3699_v42 }
 0xf36   :  { %v1716_v43 = vsel %vm183_vm3, %v3699_v42, %v1715_v41  ;;  %v2246_v41 = vld [vmem:[#allocation7 + $0x50] sm:$0xff] }
 0xf37   :  { %3408 = vmatmul.mubr.f32.vlgmr.msra.gmra.mxu0 %v1716_v43 }
 0xf38   :  { %3446 = vmatpush3.msra.mxu0 %v4540_v23  ;;  %3477 = vmatprep.mubr.msk.f32.mxu0 %vm3816_vm2, %v3815_v0 }
 0xf39   :  { %3447 = vmatprep.subr.mxu0 %v3815_v0 }
 0xf3a   :  { %3448 = vmatpush3.msra.mxu0 %v4542_v25 }
 0xf3b   :  { %3449 = vmatprep.subr.mxu0 %v3815_v0 }
 0xf3c   :  { %3450 = vmatpush3.msra.mxu0 %v4547_v26 }
 0xf3d   :  { %3451 = vmatprep.subr.mxu0 %v3815_v0 }
 0xf3e   :  { %3452 = vmatpush3.msra.mxu0 %v4551_v27 }
 0xf3f   :  { %3453 = vmatprep.subr.mxu0 %v3815_v0 }
 0xf40   :  { %3454 = vmatpush3.msra.mxu0 %v4555_v28 }
 0xf41   :  { %3455 = vmatprep.subr.mxu0 %v3815_v0 }
 0xf42   :  { %3456 = vmatpush3.msra.mxu0 %v4559_v29 }
 0xf43   :  { %3457 = vmatprep.subr.mxu0 %v3815_v0 }
 0xf44   :  { %3458 = vmatpush3.msra.mxu0 %v4585_v11 }
 0xf45   :  { %3459 = vmatprep.subr.mxu0 %v3815_v0 }
 0xf46   :  { %3460 = vmatpush3.msra.mxu0 %v4590_v13 }
 0xf47   :  { %3461 = vmatprep.subr.mxu0 %v3815_v0 }
 0xf48   :  { %3462 = vmatpush3.msra.mxu0 %v4596_v34 }
 0xf49   :  { %3463 = vmatprep.subr.mxu0 %v3815_v0 }
 0xf4a   :  { %3464 = vmatpush3.msra.mxu0 %v4598_v35 }
 0xf4b   :  { %3465 = vmatprep.subr.mxu0 %v3815_v0 }
 0xf4c   :  { %3466 = vmatpush3.msra.mxu0 %v4604_v36 }
 0xf4d   :  { %3467 = vmatprep.subr.mxu0 %v3815_v0 }
 0xf4e   :  { %3468 = vmatpush3.msra.mxu0 %v4610_v60 }
 0xf4f   :  { %3469 = vmatprep.subr.mxu0 %v3815_v0 }
 0xf50   :  { %3470 = vmatpush3.msra.mxu0 %v4616_v61 }
 0xf51   :  { %3471 = vmatprep.subr.mxu0 %v3815_v0 }
 0xf52   :  { %3472 = vmatpush3.msra.mxu0 %v4622_v62 }
 0xf53   :  { %3473 = vmatprep.subr.mxu0 %v3815_v0 }
 0xf54   :  { %3474 = vmatpush3.msra.mxu0 %v4628_v63 }
 0xf55   :  { %3475 = vmatprep.subr.mxu0 %v3815_v0 }
 0xf56   :  { %3476 = vmatpush3.msra.mxu0 %v4634_v1 }
 0xf57   :  { %3515 = vmatprep.subr.mxu0 %v3815_v0 }
 0xff7   :  { %v1784_v44 = vpop.f32.mrf.mxu0 }
 0xff8   :  { %v1789_v45 = vrot.slane %v1784_v44, 6  ;;  %v1790_v46 = vrot.slane %v1784_v44, 7 }
 0xff9   :  { %v3409_v47 = vpop.f32.mrf.mxu0 }
 0xffa   :  { %v1793_v48 = vadd.f32 %v1789_v45, %v4650_v32  ;;  %v1794_v49 = vadd.f32 %v1790_v46, %v4648_v24 }
 0xffc   :  { %3700 = vtanh.f32 %v1793_v48 }
 0xffd   :  { %3702 = vtanh.f32 %v1794_v49 }
0x1009   :  { %v3701_v50 = vpop.eup %3700 }
0x100a   :  { %v3703_v52 = vpop.eup %3702  ;;  %v1799_v53 = vrot.slane %v3701_v50, 2  ;;  %v2224_v54 = vsel %vm776_vm5, %v2222_v51, %v3701_v50 }
0x100b   :  { %v1800_v56 = vrot.slane %v3703_v52, 1  ;;  %v2225_v57 = vsel %vm776_vm5, %v2223_v55, %v3703_v52  ;;  %v2245_v55 = vld [vmem:[#allocation7 + $0x48] sm:$0xff] }
0x100d   :  { %v1801_v58 = vsel %vm183_vm3, %v1800_v56, %v1799_v53  ;;  %v2244_v56 = vld [vmem:[#allocation7 + $0x40] sm:$0xff] }
0x100e   :  { %3443 = vmatmul.mubr.f32.vlgmr.msra.gmra.mxu1 %v1801_v58  ;;  %v2242_v58 = vld [vmem:[#allocation7 + $0x30] sm:$0xff] }
0x100f   :  { %3481 = vmatpush3.msra.mxu1 %v4540_v23  ;;  %3512 = vmatprep.mubr.msk.f32.mxu1 %vm3816_vm2, %v3815_v0 }
0x1010   :  { %3482 = vmatprep.subr.mxu1 %v3815_v0 }
0x1011   :  { %3483 = vmatpush3.msra.mxu1 %v4542_v25 }
0x1012   :  { %3484 = vmatprep.subr.mxu1 %v3815_v0 }
0x1013   :  { %3485 = vmatpush3.msra.mxu1 %v4547_v26 }
0x1014   :  { %3486 = vmatprep.subr.mxu1 %v3815_v0 }
0x1015   :  { %3487 = vmatpush3.msra.mxu1 %v4551_v27 }
0x1016   :  { %3488 = vmatprep.subr.mxu1 %v3815_v0 }
0x1017   :  { %3489 = vmatpush3.msra.mxu1 %v4555_v28 }
0x1018   :  { %3490 = vmatprep.subr.mxu1 %v3815_v0 }
0x1019   :  { %3491 = vmatpush3.msra.mxu1 %v4559_v29 }
0x101a   :  { %3492 = vmatprep.subr.mxu1 %v3815_v0 }
0x101b   :  { %3493 = vmatpush3.msra.mxu1 %v4585_v11 }
0x101c   :  { %3494 = vmatprep.subr.mxu1 %v3815_v0 }
0x101d   :  { %3495 = vmatpush3.msra.mxu1 %v4590_v13 }
0x101e   :  { %3496 = vmatprep.subr.mxu1 %v3815_v0 }
0x101f   :  { %3497 = vmatpush3.msra.mxu1 %v4596_v34 }
0x1020   :  { %3498 = vmatprep.subr.mxu1 %v3815_v0 }
0x1021   :  { %3499 = vmatpush3.msra.mxu1 %v4598_v35 }
0x1022   :  { %3500 = vmatprep.subr.mxu1 %v3815_v0 }
0x1023   :  { %3501 = vmatpush3.msra.mxu1 %v4604_v36 }
0x1024   :  { %3502 = vmatprep.subr.mxu1 %v3815_v0 }
0x1025   :  { %3503 = vmatpush3.msra.mxu1 %v4610_v60 }
0x1026   :  { %3504 = vmatprep.subr.mxu1 %v3815_v0 }
0x1027   :  { %3505 = vmatpush3.msra.mxu1 %v4616_v61 }
0x1028   :  { %3506 = vmatprep.subr.mxu1 %v3815_v0 }
0x1029   :  { %3507 = vmatpush3.msra.mxu1 %v4622_v62 }
0x102a   :  { %3508 = vmatprep.subr.mxu1 %v3815_v0 }
0x102b   :  { %3509 = vmatpush3.msra.mxu1 %v4628_v63 }
0x102c   :  { %3510 = vmatprep.subr.mxu1 %v3815_v0 }
0x102d   :  { %3511 = vmatpush3.msra.mxu1 %v4634_v1 }
0x102e   :  { %3550 = vmatprep.subr.mxu1 %v3815_v0 }
0x10ce   :  { %v1869_v59 = vpop.f32.mrf.mxu1 }
0x10cf   :  { %v1874_v3 = vrot.slane %v1869_v59, 5  ;;  %v1875_v20 = vrot.slane %v1869_v59, 6  ;;  %v2241_v59 = vld [vmem:[#allocation7 + $0x28] sm:$0xff] }
0x10d0   :  { %v3444_v21 = vpop.f32.mrf.mxu1 }
0x10d1   :  { %v1878_v30 = vadd.f32 %v1874_v3, %v4650_v32  ;;  %v1879_v9 = vadd.f32 %v1875_v20, %v4648_v24  ;;  %v2240_v3 = vld [vmem:[#allocation7 + $0x20] sm:$0xff]  ;;  %v2239_v20 = vld [vmem:[#allocation7 + $0x18] sm:$0xff]  ;;  %v2238_v21 = vld [vmem:[#allocation7 + $0x10] sm:$0xff] }
0x10d3   :  { %3704 = vtanh.f32 %v1878_v30  ;;  %v2237_v30 = vld [vmem:[#allocation7 + $0x8] sm:$0xff] }
0x10d4   :  { %3706 = vtanh.f32 %v1879_v9  ;;  %v2236_v9 = vld [vmem:[#allocation7] sm:$0xff] }
0x10e0   :  { %v3705_v10 = vpop.eup %3704 }
0x10e1   :  { %v3707_v12 = vpop.eup %3706  ;;  %v1884_v14 = vrot.slane %v3705_v10, 3  ;;  %v2226_v15 = vsel %vm779_vm6, %v2224_v54, %v3705_v10 }
0x10e2   :  { %v1885_v16 = vrot.slane %v3707_v12, 2  ;;  %v2227_v17 = vsel %vm779_vm6, %v2225_v57, %v3707_v12  ;;  %v2243_v57 = vld [vmem:[#allocation7 + $0x38] sm:$0xff] }
0x10e4   :  { %v1886_v18 = vsel %vm183_vm3, %v1885_v16, %v1884_v14 }
0x10e5   :  { %3478 = vmatmul.mubr.f32.vlgmr.msra.gmra.mxu0 %v1886_v18 }
0x10e6   :  { %3516 = vmatpush3.msra.mxu0 %v4540_v23  ;;  %3547 = vmatprep.mubr.msk.f32.mxu0 %vm3816_vm2, %v3815_v0 }
0x10e7   :  { %3517 = vmatprep.subr.mxu0 %v3815_v0 }
0x10e8   :  { %3518 = vmatpush3.msra.mxu0 %v4542_v25 }
0x10e9   :  { %3519 = vmatprep.subr.mxu0 %v3815_v0 }
0x10ea   :  { %3520 = vmatpush3.msra.mxu0 %v4547_v26 }
0x10eb   :  { %3521 = vmatprep.subr.mxu0 %v3815_v0 }
0x10ec   :  { %3522 = vmatpush3.msra.mxu0 %v4551_v27 }
0x10ed   :  { %3523 = vmatprep.subr.mxu0 %v3815_v0 }
0x10ee   :  { %3524 = vmatpush3.msra.mxu0 %v4555_v28 }
0x10ef   :  { %3525 = vmatprep.subr.mxu0 %v3815_v0 }
0x10f0   :  { %3526 = vmatpush3.msra.mxu0 %v4559_v29 }
0x10f1   :  { %3527 = vmatprep.subr.mxu0 %v3815_v0 }
0x10f2   :  { %3528 = vmatpush3.msra.mxu0 %v4585_v11 }
0x10f3   :  { %3529 = vmatprep.subr.mxu0 %v3815_v0 }
0x10f4   :  { %3530 = vmatpush3.msra.mxu0 %v4590_v13 }
0x10f5   :  { %3531 = vmatprep.subr.mxu0 %v3815_v0 }
0x10f6   :  { %3532 = vmatpush3.msra.mxu0 %v4596_v34 }
0x10f7   :  { %3533 = vmatprep.subr.mxu0 %v3815_v0 }
0x10f8   :  { %3534 = vmatpush3.msra.mxu0 %v4598_v35 }
0x10f9   :  { %3535 = vmatprep.subr.mxu0 %v3815_v0 }
0x10fa   :  { %3536 = vmatpush3.msra.mxu0 %v4604_v36 }
0x10fb   :  { %3537 = vmatprep.subr.mxu0 %v3815_v0 }
0x10fc   :  { %3538 = vmatpush3.msra.mxu0 %v4610_v60 }
0x10fd   :  { %3539 = vmatprep.subr.mxu0 %v3815_v0 }
0x10fe   :  { %3540 = vmatpush3.msra.mxu0 %v4616_v61 }
0x10ff   :  { %3541 = vmatprep.subr.mxu0 %v3815_v0 }
0x1100   :  { %3542 = vmatpush3.msra.mxu0 %v4622_v62 }
0x1101   :  { %3543 = vmatprep.subr.mxu0 %v3815_v0 }
0x1102   :  { %3544 = vmatpush3.msra.mxu0 %v4628_v63 }
0x1103   :  { %3545 = vmatprep.subr.mxu0 %v3815_v0 }
0x1104   :  { %3546 = vmatpush3.msra.mxu0 %v4634_v1 }
0x11a5   :  { %v1954_v19 = vpop.f32.mrf.mxu0 }
0x11a6   :  { %v1959_v2 = vrot.slane %v1954_v19, 4  ;;  %v1960_v22 = vrot.slane %v1954_v19, 5 }
0x11a7   :  { %v3479_v31 = vpop.f32.mrf.mxu0 }
0x11a8   :  { %v1963_v33 = vadd.f32 %v1959_v2, %v4650_v32  ;;  %v1964_v4 = vadd.f32 %v1960_v22, %v4648_v24  ;;  %v2360_v31 = vld [vmem:[%s4880_s6] ss:$0 sm:$0xff] }
0x11aa   :  { %3708 = vtanh.f32 %v1963_v33 }
0x11ab   :  { %3710 = vtanh.f32 %v1964_v4 }
0x11b7   :  { %v3709_v5 = vpop.eup %3708 }
0x11b8   :  { %v3711_v6 = vpop.eup %3710  ;;  %v1969_v7 = vrot.slane %v3709_v5, 4  ;;  %v2228_v8 = vsel %vm782_vm7, %v2226_v15, %v3709_v5 }
0x11b9   :  { %v1970_v37 = vrot.slane %v3711_v6, 3  ;;  %v2229_v38 = vsel %vm782_vm7, %v2227_v17, %v3711_v6 }
0x11bb   :  { %v1971_v39 = vsel %vm183_vm3, %v1970_v37, %v1969_v7 }
0x11bc   :  { %3513 = vmatmul.mubr.f32.vlgmr.msra.gmra.mxu1 %v1971_v39 }
0x11bd   :  { %3551 = vmatpush3.msra.mxu1 %v4540_v23  ;;  %3582 = vmatprep.mubr.msk.f32.mxu1 %vm3816_vm2, %v3815_v0 }
0x11be   :  { %3552 = vmatprep.subr.mxu1 %v3815_v0 }
0x11bf   :  { %3553 = vmatpush3.msra.mxu1 %v4542_v25 }
0x11c0   :  { %3554 = vmatprep.subr.mxu1 %v3815_v0 }
0x11c1   :  { %3555 = vmatpush3.msra.mxu1 %v4547_v26 }
0x11c2   :  { %3556 = vmatprep.subr.mxu1 %v3815_v0 }
0x11c3   :  { %3557 = vmatpush3.msra.mxu1 %v4551_v27 }
0x11c4   :  { %3558 = vmatprep.subr.mxu1 %v3815_v0 }
0x11c5   :  { %3559 = vmatpush3.msra.mxu1 %v4555_v28 }
0x11c6   :  { %3560 = vmatprep.subr.mxu1 %v3815_v0 }
0x11c7   :  { %3561 = vmatpush3.msra.mxu1 %v4559_v29 }
0x11c8   :  { %3562 = vmatprep.subr.mxu1 %v3815_v0 }
0x11c9   :  { %3563 = vmatpush3.msra.mxu1 %v4585_v11 }
0x11ca   :  { %3564 = vmatprep.subr.mxu1 %v3815_v0 }
0x11cb   :  { %3565 = vmatpush3.msra.mxu1 %v4590_v13 }
0x11cc   :  { %3566 = vmatprep.subr.mxu1 %v3815_v0 }
0x11cd   :  { %3567 = vmatpush3.msra.mxu1 %v4596_v34 }
0x11ce   :  { %3568 = vmatprep.subr.mxu1 %v3815_v0 }
0x11cf   :  { %3569 = vmatpush3.msra.mxu1 %v4598_v35 }
0x11d0   :  { %3570 = vmatprep.subr.mxu1 %v3815_v0 }
0x11d1   :  { %3571 = vmatpush3.msra.mxu1 %v4604_v36 }
0x11d2   :  { %3572 = vmatprep.subr.mxu1 %v3815_v0 }
0x11d3   :  { %3573 = vmatpush3.msra.mxu1 %v4610_v60 }
0x11d4   :  { %3574 = vmatprep.subr.mxu1 %v3815_v0 }
0x11d5   :  { %3575 = vmatpush3.msra.mxu1 %v4616_v61  ;;  %v2251_v61 = vld [vmem:[#allocation7 + $0x78] sm:$0xff] }
0x11d6   :  { %3576 = vmatprep.subr.mxu1 %v3815_v0  ;;  %3585 = vmatprep.subr.mxu0 %v2251_v61 }
0x11d7   :  { %3577 = vmatpush3.msra.mxu1 %v4622_v62  ;;  %v2250_v62 = vld [vmem:[#allocation7 + $0x70] sm:$0xff] }
0x11d8   :  { %3578 = vmatprep.subr.mxu1 %v3815_v0 }
0x11d9   :  { %3579 = vmatpush3.msra.mxu1 %v4628_v63  ;;  %v2249_v63 = vld [vmem:[#allocation7 + $0x68] sm:$0xff] }
0x11da   :  { %3580 = vmatprep.subr.mxu1 %v3815_v0 }
0x11db   :  { %3581 = vmatpush3.msra.mxu1 %v4634_v1  ;;  %v2248_v1 = vld [vmem:[#allocation7 + $0x60] sm:$0xff] }
0x127c   :  { %v2039_v23 = vpop.f32.mrf.mxu1 }
0x127d   :  { %v2044_v25 = vrot.slane %v2039_v23, 3  ;;  %v2045_v26 = vrot.slane %v2039_v23, 4 }
0x127e   :  { %v3514_v27 = vpop.f32.mrf.mxu1 }
0x127f   :  { %v2048_v28 = vadd.f32 %v2044_v25, %v4650_v32  ;;  %v2049_v29 = vadd.f32 %v2045_v26, %v4648_v24 }
0x1281   :  { %3712 = vtanh.f32 %v2048_v28 }
0x1282   :  { %3714 = vtanh.f32 %v2049_v29 }
0x128e   :  { %v3713_v11 = vpop.eup %3712 }
0x128f   :  { %v3715_v13 = vpop.eup %3714  ;;  %v2054_v34 = vrot.slane %v3713_v11, 5  ;;  %v2230_v35 = vsel %vm785_vm8, %v2228_v8, %v3713_v11 }
0x1290   :  { %v2055_v36 = vrot.slane %v3715_v13, 4  ;;  %v2231_v0 = vsel %vm785_vm8, %v2229_v38, %v3715_v13 }
0x1292   :  { %v2056_v60 = vsel %vm183_vm3, %v2055_v36, %v2054_v34 }
0x1293   :  { %3548 = vmatmul.mubr.f32.vlgmr.msra.gmra.mxu0 %v2056_v60 }
0x1294   :  { %3586 = vmatpush3.msra.mxu0 %v2251_v61 }
0x1295   :  { %3587 = vmatprep.subr.mxu0 %v2250_v62 }
0x1296   :  { %3588 = vmatpush3.msra.mxu0 %v2250_v62 }
0x1297   :  { %3589 = vmatprep.subr.mxu0 %v2249_v63 }
0x1298   :  { %3590 = vmatpush3.msra.mxu0 %v2249_v63 }
0x1299   :  { %3591 = vmatprep.subr.mxu0 %v2248_v1 }
0x129a   :  { %3592 = vmatpush3.msra.mxu0 %v2248_v1 }
0x129b   :  { %3593 = vmatprep.subr.mxu0 %v2247_v40 }
0x129c   :  { %3594 = vmatpush3.msra.mxu0 %v2247_v40 }
0x129d   :  { %3595 = vmatprep.subr.mxu0 %v2246_v41 }
0x129e   :  { %3596 = vmatpush3.msra.mxu0 %v2246_v41 }
0x129f   :  { %3597 = vmatprep.subr.mxu0 %v2245_v55 }
0x12a0   :  { %3598 = vmatpush3.msra.mxu0 %v2245_v55 }
0x12a1   :  { %3599 = vmatprep.subr.mxu0 %v2244_v56 }
0x12a2   :  { %3600 = vmatpush3.msra.mxu0 %v2244_v56 }
0x12a3   :  { %3601 = vmatprep.subr.mxu0 %v2243_v57 }
0x12a4   :  { %3602 = vmatpush3.msra.mxu0 %v2243_v57 }
0x12a5   :  { %3603 = vmatprep.subr.mxu0 %v2242_v58 }
0x12a6   :  { %3604 = vmatpush3.msra.mxu0 %v2242_v58 }
0x12a7   :  { %3605 = vmatprep.subr.mxu0 %v2241_v59 }
0x12a8   :  { %3606 = vmatpush3.msra.mxu0 %v2241_v59 }
0x12a9   :  { %3607 = vmatprep.subr.mxu0 %v2240_v3 }
0x12aa   :  { %3608 = vmatpush3.msra.mxu0 %v2240_v3 }
0x12ab   :  { %3609 = vmatprep.subr.mxu0 %v2239_v20 }
0x12ac   :  { %3610 = vmatpush3.msra.mxu0 %v2239_v20 }
0x12ad   :  { %3611 = vmatprep.subr.mxu0 %v2238_v21 }
0x12ae   :  { %3612 = vmatpush3.msra.mxu0 %v2238_v21 }
0x12af   :  { %3613 = vmatprep.subr.mxu0 %v2237_v30 }
0x12b0   :  { %3614 = vmatpush3.msra.mxu0 %v2237_v30 }
0x12b1   :  { %3615 = vmatprep.subr.mxu0 %v2236_v9 }
0x12b2   :  { %3616 = vmatpush3.msra.mxu0 %v2236_v9 }
0x1353   :  { %v2124_v42 = vpop.f32.mrf.mxu0 }
0x1354   :  { %v2129_v43 = vrot.slane %v2124_v42, 2  ;;  %v2130_v44 = vrot.slane %v2124_v42, 3 }
0x1355   :  { %v3549_v45 = vpop.f32.mrf.mxu0 }
0x1356   :  { %v2133_v46 = vadd.f32 %v2129_v43, %v4650_v32  ;;  %v2134_v47 = vadd.f32 %v2130_v44, %v4648_v24 }
0x1358   :  { %3716 = vtanh.f32 %v2133_v46 }
0x1359   :  { %3718 = vtanh.f32 %v2134_v47 }
0x1365   :  { %v3717_v48 = vpop.eup %3716 }
0x1366   :  { %v3719_v49 = vpop.eup %3718  ;;  %v2139_v50 = vrot.slane %v3717_v48, 6  ;;  %v2232_v51 = vsel %vm99_vm0, %v2230_v35, %v3717_v48 }
0x1367   :  { %v2140_v52 = vrot.slane %v3719_v49, 5  ;;  %v2233_v53 = vsel %vm99_vm0, %v2231_v0, %v3719_v49 }
0x1369   :  { %v2141_v54 = vsel %vm183_vm3, %v2140_v52, %v2139_v50 }
0x136a   :  { %3583 = vmatmul.mubr.f32.vlgmr.msra.gmra.mxu1 %v2141_v54 }
0x142a   :  { %v2209_v10 = vpop.f32.mrf.mxu1 }
0x142b   :  { %v2214_v12 = vrot.slane %v2209_v10, 1  ;;  %v2215_v14 = vrot.slane %v2209_v10, 2 }
0x142c   :  { %v3584_v15 = vpop.f32.mrf.mxu1 }
0x142d   :  { %v2218_v16 = vadd.f32 %v2214_v12, %v4650_v32  ;;  %v2219_v17 = vadd.f32 %v2215_v14, %v4648_v24 }
0x142f   :  { %3720 = vtanh.f32 %v2218_v16 }
0x1430   :  { %3722 = vtanh.f32 %v2219_v17 }
0x143c   :  { %v3721_v18 = vpop.eup %3720 }
0x143d   :  { %v3723_v19 = vpop.eup %3722  ;;  %v2234_v2 = vsel %vm790_vm9, %v2232_v51, %v3721_v18 }
0x143e   :  { %3617 = vmatprep.mubr.f32.mxu0 %v2234_v2  ;;  %v2235_v22 = vsel %vm790_vm9, %v2233_v53, %v3723_v19 }
0x143f   :  { %3618 = vmatmul.mubr.f32.vlgmr.msra.gmra.mxu0 %v2235_v22 }
0x14ff   :  { %v3619_v33 = vpop.f32.mrf.mxu0 }
0x1500   :  { %v2331_v32 = vadd.f32 %v3619_v33, %v2360_v31 }
0x1501   :  { %v2325_v4 = vpop.f32.mrf.mxu0 }
0x1502   :  { %2335 = vst [vmem:[#allocation8 + $0x8] sm:$0xff] %v2331_v32  ;;  %v2326_v24 = vadd.f32 %v2360_v31, %v2325_v4 }
0x1504   :  { %2334 = vst [vmem:[#allocation8] sm:$0xff] %v2326_v24 }
0x1505   :  { %3795 = shalt.err (!%p3792_p5)
}
0x1506   :  { %2347 = dma.vmem_to_hbm [thread:$0]  %s2342_s27, 256, %s4881_s7, [#allocation4], %s3812_s29, %s3812_s29, %s3813_s30  }
0x1507   :  { %3808 = dma.done.wait [#allocation4], 256  }
0x1508   :  { %3809 = vsyncadd [#allocation4], 4294967040 }
0x1509   :  { %2351 = vsyncpa [#allocation3], 1 }
0x150a   :  { %2352 = vsyncpa [#allocation6], 1 }
0x150b   :  { %2353 = vsyncpa [#allocation4], 1 }

</bundles_post_ra>
